<compile_context>
chip_gen: v7x
topology: tpu7x:2x2x1
jax: 0.10.0
libtpu: 0.0.40
codegen_flags: <defaults>
</compile_context>

<pallas_src>
import math

import jax
import jax.numpy as jnp
from jax import lax
from jax.experimental import pallas as pl
from jax.experimental.pallas import tpu as pltpu


# ---------------------------------------------------------------------------
# Exact (erf-based) GELU matching torch.nn.GELU() (approximate='none').
# erf uses XLA's clipped f32 rational approximation (pure VPU Horner chains);
# inside the kernel the final divide goes through pl.reciprocal(approx=True),
# i.e. the EUP vrcp slot.
# ---------------------------------------------------------------------------
_ERF_ALPHA = (-2.72614225801306e-10, 2.77068142495902e-08, -2.10102402082508e-06,
              -5.69250639462346e-05, -7.34990630326855e-04, -2.95459980854025e-03,
              -1.60960333262415e-02)
_ERF_BETA = (-1.45660718464996e-05, -2.13374055278905e-04, -1.68282697438203e-03,
             -7.37332916720468e-03, -1.42647390514189e-02)


def _erf_f32(x, recip):
    x = jnp.clip(x, -4.0, 4.0)
    x2 = x * x
    p = jnp.full_like(x2, _ERF_ALPHA[0])
    for c in _ERF_ALPHA[1:]:
        p = p * x2 + c
    q = jnp.full_like(x2, _ERF_BETA[0])
    for c in _ERF_BETA[1:]:
        q = q * x2 + c
    return x * p * recip(q)


def _gelu(x, recip=lambda v: 1.0 / v):
    return 0.5 * x * (1.0 + _erf_f32(x * 0.7071067811865476, recip))


# ---------------------------------------------------------------------------
# Kernel: G images per grid step, data held as (channels, G*H*W) with the
# concatenated pixel axis on lanes.  Scratch holds the lane-concatenated input
# (also the residual) and the (9*M, G*H*W) im2col slab for conv2.
# ---------------------------------------------------------------------------
def _make_kernel(H, W, G, compute_dtype):
    P = H * W
    GP = G * P

    def kernel(x_ref, edge_ref, w1_ref, b1_ref, w2_ref, b2_ref, w3_ref, b3_ref,
               o_ref, xcat_ref, col_ref):
        M = w1_ref.shape[0]                               # padded mid channels
        recip = lambda v: pl.reciprocal(v, approx=True)   # EUP vrcp

        # Assemble the G per-image (C, P) pages into one lane-dense (C, G*P)
        # slab; it is both the conv1 RHS and the residual.
        if G == 1:
            x2 = x_ref[0]
        else:
            for g in range(G):
                xcat_ref[:, g * P:(g + 1) * P] = x_ref[g]
            x2 = xcat_ref[...]

        # Image-border masks, broadcast once and reused by every tap.
        def border(i):
            return jnp.broadcast_to(edge_ref[i:i + 1, :], (M, GP)) > 0.5

        left, right, top, bottom = border(0), border(1), border(2), border(3)

        # conv1: 1x1 conv (BN folded) + GELU on exactly G*H*W pixels.
        h1 = jnp.dot(w1_ref[...], x2.astype(compute_dtype),
                     preferred_element_type=jnp.float32) + b1_ref[...]
        h1 = _gelu(h1, recip=recip)                       # (M, G*P) f32

        # Replicate-padded 3x3 taps: lane rotation (XLU) + border select (VPU).
        # Rolls run over the concatenated G*P lane axis; the per-pixel border
        # masks clamp every image edge, so no tap leaks across images.
        def shift(a, off, border_mask):
            rolled = pltpu.roll(a, (-off) % GP, axis=1)
            return jnp.where(border_mask, a, rolled)

        taps_x = (shift(h1, -1, left), h1, shift(h1, 1, right))
        for ky in range(3):
            for kx in range(3):
                t = taps_x[kx]
                if ky == 0:                               # row y-1, clamp at top
                    t = shift(t, -W, top)
                elif ky == 2:                             # row y+1, clamp at bottom
                    t = shift(t, W, bottom)
                r0 = (ky * 3 + kx) * M
                col_ref[r0:r0 + M, :] = t.astype(compute_dtype)

        # conv2: one MXU dot with K = 9*M (BN folded) + GELU.
        h2 = jnp.dot(w2_ref[...], col_ref[...],
                     preferred_element_type=jnp.float32) + b2_ref[...]
        h2 = _gelu(h2, recip=recip)                       # (M, G*P) f32

        # conv3: 1x1 conv (BN folded, no activation) + residual from the
        # already-resident f32 input (no extra HBM read).
        h3 = jnp.dot(w3_ref[...], h2.astype(compute_dtype),
                     preferred_element_type=jnp.float32) + b3_ref[...]
        y = h3 + x2                                       # (C, G*P) f32
        for g in range(G):
            o_ref[g] = y[:, g * P:(g + 1) * P]

    return kernel


def lime_conv_block(x_nchw, params, *, images_per_step=None,
                    compute_dtype=jnp.float32):
    w1, b1, w2, b2, w3, b3 = params
    B, C, H, W = x_nchw.shape
    M = w1.shape[1]
    P = H * W
    cdt = jnp.dtype(compute_dtype)

    # Pad mid channels to the sublane tile of the compute dtype (8 for f32,
    # 16 for bf16) so every im2col store is a full, tile-aligned vst.  Padded
    # channels carry zero weights/bias -> GELU(0)=0 -> they contribute nothing.
    sub = 8 * (4 // cdt.itemsize)
    Mp = ((M + sub - 1) // sub) * sub
    if Mp != M:
        w1 = jnp.pad(w1, ((0, 0), (0, Mp - M)))
        b1 = jnp.pad(b1, (0, Mp - M))
        w2 = jnp.pad(w2, ((0, 0), (0, 0), (0, Mp - M), (0, Mp - M)))
        b2 = jnp.pad(b2, (0, Mp - M))
        w3 = jnp.pad(w3, ((0, Mp - M), (0, 0)))

    # Images per grid step: widen the lane axis toward >=512 lanes per step
    # (tile sweeps: ~85% of HBM roofline) while keeping >=2 grid steps when
    # the batch allows it so both v7x TensorCores get work.
    if images_per_step is None:
        images_per_step = 1
        for g in range(2, B + 1):
            if B % g:
                continue
            if B >= 2 and B // g < 2:
                break
            if g * P * max(C, 9 * Mp) * cdt.itemsize > 8 * 1024 * 1024:
                break
            images_per_step = g
            if g * P >= 512:
                break
    G = images_per_step
    assert B % G == 0, "images_per_step must divide the batch"
    GP = G * P

    xf = x_nchw.reshape(B, C, P)           # free reshape: NCHW stays contiguous

    # Kernel-form folded weights: output channel on sublanes, contraction lanes.
    w1k = w1.T.astype(compute_dtype)                       # (Mp, C)
    w2k = w2.reshape(9 * Mp, Mp).T.astype(compute_dtype)   # (Mp, 9Mp)
    w3k = w3.T.astype(compute_dtype)                       # (C, Mp)
    b1k = b1.reshape(Mp, 1).astype(jnp.float32)
    b2k = b2.reshape(Mp, 1).astype(jnp.float32)
    b3k = b3.reshape(C, 1).astype(jnp.float32)

    # Per-pixel border masks for the in-kernel replicate padding, tiled across
    # the G images sharing the lane axis (tiny constant input).
    pix = jnp.arange(GP, dtype=jnp.int32) % P
    cidx = pix % W
    ridx = pix // W
    edge = jnp.stack([cidx == 0, cidx == W - 1,
                      ridx == 0, ridx == H - 1]).astype(jnp.float32)   # (4, GP)

    # Scoped-VMEM request derived from the actual footprint, clamped to v7x's
    # 64 MiB physical VMEM.
    act_blk = G * C * P * 4
    w_bytes = (Mp * C + Mp * 9 * Mp + C * Mp) * cdt.itemsize + (2 * Mp + C) * 4
    edge_bytes = 4 * GP * 4
    scratch_bytes = C * GP * 4 + 9 * Mp * GP * cdt.itemsize
    need = 4 * act_blk + 2 * (w_bytes + edge_bytes) + scratch_bytes
    vmem_limit = int(min(64 * 1024 * 1024, max(4 * 1024 * 1024, 2 * need)))

    out = pl.pallas_call(
        _make_kernel(H, W, G, compute_dtype),
        out_shape=jax.ShapeDtypeStruct((B, C, P), jnp.float32),
        grid_spec=pltpu.PrefetchScalarGridSpec(
            num_scalar_prefetch=0,
            grid=(B // G,),
            in_specs=[
                pl.BlockSpec((G, C, P), lambda i: (i, 0, 0)),   # x, G images/step
                pl.BlockSpec((4, GP), lambda i: (0, 0)),        # border masks
                pl.BlockSpec((Mp, C), lambda i: (0, 0)),        # w1 (BN folded)
                pl.BlockSpec((Mp, 1), lambda i: (0, 0)),        # b1
                pl.BlockSpec((Mp, 9 * Mp), lambda i: (0, 0)),   # w2, im2col form
                pl.BlockSpec((Mp, 1), lambda i: (0, 0)),        # b2
                pl.BlockSpec((C, Mp), lambda i: (0, 0)),        # w3 (BN folded)
                pl.BlockSpec((C, 1), lambda i: (0, 0)),         # b3
            ],
            out_specs=pl.BlockSpec((G, C, P), lambda i: (i, 0, 0)),
            scratch_shapes=[
                pltpu.VMEM((C, GP), jnp.float32),         # lane-concat x / residual
                pltpu.VMEM((9 * Mp, GP), compute_dtype),  # im2col slab
            ],
        ),
        compiler_params=pltpu.CompilerParams(
            dimension_semantics=("parallel",),
            vmem_limit_bytes=vmem_limit,
        ),
    )(xf, edge, w1k, b1k, w2k, b2k, w3k, b3k)

    return out.reshape(B, C, H, W)


# ---------------------------------------------------------------------------
# Deterministic parameter construction (PyTorch layouts), then BN folding.
# ---------------------------------------------------------------------------
def make_params(key, in_ch, mid_ch, eps=1e-5):
    ks = jax.random.split(key, 15)

    # conv weights in PyTorch layout (out, in, kh, kw), bias=False everywhere
    w1_t = jax.random.normal(ks[0], (mid_ch, in_ch, 1, 1), jnp.float32) / math.sqrt(in_ch)
    w2_t = jax.random.normal(ks[1], (mid_ch, mid_ch, 3, 3), jnp.float32) / math.sqrt(mid_ch * 9)
    w3_t = jax.random.normal(ks[2], (in_ch, mid_ch, 1, 1), jnp.float32) / math.sqrt(mid_ch)

    def bn(kg, kb, km, kv, n):
        gamma = 1.0 + 0.1 * jax.random.normal(kg, (n,), jnp.float32)
        beta = 0.1 * jax.random.normal(kb, (n,), jnp.float32)
        mean = 0.1 * jax.random.normal(km, (n,), jnp.float32)
        var = 1.0 + 0.1 * jnp.abs(jax.random.normal(kv, (n,), jnp.float32))
        scale = gamma / jnp.sqrt(var + eps)
        bias = beta - mean * scale
        return scale, bias

    s1, bb1 = bn(ks[3], ks[4], ks[5], ks[6], mid_ch)
    s2, bb2 = bn(ks[7], ks[8], ks[9], ks[10], mid_ch)
    s3, bb3 = bn(ks[11], ks[12], ks[13], ks[14], in_ch)

    # fold BN (eval mode) into the conv weights; channels-last matmul/HWIO form
    w1 = jnp.transpose(w1_t[:, :, 0, 0]) * s1[None, :]                  # (C, M)
    w2 = jnp.transpose(w2_t, (2, 3, 1, 0)) * s2[None, None, None, :]    # (3,3,M,M) HWIO
    w3 = jnp.transpose(w3_t[:, :, 0, 0]) * s3[None, :]                  # (M, C)
    return w1, bb1, w2, bb2, w3, bb3


# Pure-JAX reference (same math via lax.conv) for a correctness check.
def reference(x_nchw, params):
    w1, b1, w2, b2, w3, b3 = params
    x = jnp.transpose(x_nchw, (0, 2, 3, 1))
    h1 = _gelu(jnp.einsum("bhwc,cm->bhwm", x, w1) + b1)
    h1p = jnp.pad(h1, ((0, 0), (1, 1), (1, 1), (0, 0)), mode="edge")
    h2 = lax.conv_general_dilated(h1p, w2, (1, 1), "VALID",
                                  dimension_numbers=("NHWC", "HWIO", "NHWC"))
    h2 = _gelu(h2 + b2)
    h3 = jnp.einsum("bhwm,mc->bhwc", h2, w3) + b3
    return jnp.transpose(h3 + x, (0, 3, 1, 2))


if __name__ == "__main__":
    key = jax.random.PRNGKey(0)
    kx, kp = jax.random.split(key)

    B, C, H, W = 4, 4, 16, 16      # batch, in_ch, spatial (grid=(2,), 2 imgs/step)
    MID = 8                        # mid_ch

    x = jax.random.normal(kx, (B, C, H, W), jnp.float32)
    params = make_params(kp, C, MID)
    ref = reference(x, params)

    # f32 MXU path (v5e-friendly); approx reciprocal on the EUP (~12-bit vrcp),
    # so the tolerance is loosened vs. an exact-divide reference.
    out = jax.block_until_ready(lime_conv_block(x, params))
    assert out.shape == (B, C, H, W)
    err = float(jnp.max(jnp.abs(out - ref)))
    if err > 2e-2:
        raise AssertionError(f"f32 kernel/reference mismatch: {err}")

    # bf16 MXU-operand path (v6e/v7x feedback); mid_ch padded to 16, bf16 col
    # slab, f32 accumulation.  Checked against the f32 reference loosely.
    out_bf16 = jax.block_until_ready(
        lime_conv_block(x, params, compute_dtype=jnp.bfloat16))
    err_bf16 = float(jnp.max(jnp.abs(out_bf16 - ref)))
    if err_bf16 > 2e-1:
        raise AssertionError(f"bf16 kernel/reference mismatch: {err_bf16}")

    print("KERNEL_OK")
</pallas_src>

<mosaic_0001>
module attributes {stable_mosaic.version = 11 : i64} {
  func.func @kernel(%arg0: i32, %arg1: memref<2x4x256xf32, #tpu.memory_space<vmem>>, %arg2: memref<4x512xf32, #tpu.memory_space<vmem>>, %arg3: memref<8x4xf32, #tpu.memory_space<vmem>>, %arg4: memref<8x1xf32, #tpu.memory_space<vmem>>, %arg5: memref<8x72xf32, #tpu.memory_space<vmem>>, %arg6: memref<8x1xf32, #tpu.memory_space<vmem>>, %arg7: memref<4x8xf32, #tpu.memory_space<vmem>>, %arg8: memref<4x1xf32, #tpu.memory_space<vmem>>, %arg9: memref<2x4x256xf32, #tpu.memory_space<vmem>>, %arg10: memref<4x512xf32, #tpu.memory_space<vmem>>, %arg11: memref<72x512xf32, #tpu.memory_space<vmem>>) attributes {dimension_semantics = [#tpu.dimension_semantics<parallel>], iteration_bounds = array<i64: 2>, scalar_prefetch = 0 : i64, scratch_operands = 2 : i64, tpu.core_type = #tpu.core_type<tc>, window_params = [{transform_indices = @transform_0, window_bounds = array<i64: 2, 4, 256>}, {pipeline_mode = #tpu.pipeline_mode<synchronous>, transform_indices = @transform_1, window_bounds = array<i64: 4, 512>}, {pipeline_mode = #tpu.pipeline_mode<synchronous>, transform_indices = @transform_2, window_bounds = array<i64: 8, 4>}, {pipeline_mode = #tpu.pipeline_mode<synchronous>, transform_indices = @transform_3, window_bounds = array<i64: 8, 1>}, {pipeline_mode = #tpu.pipeline_mode<synchronous>, transform_indices = @transform_4, window_bounds = array<i64: 8, 72>}, {pipeline_mode = #tpu.pipeline_mode<synchronous>, transform_indices = @transform_5, window_bounds = array<i64: 8, 1>}, {pipeline_mode = #tpu.pipeline_mode<synchronous>, transform_indices = @transform_6, window_bounds = array<i64: 4, 8>}, {pipeline_mode = #tpu.pipeline_mode<synchronous>, transform_indices = @transform_7, window_bounds = array<i64: 4, 1>}, {transform_indices = @transform_8, window_bounds = array<i64: 2, 4, 256>}]} {
    %c0 = arith.constant 0 : index
    %c0_0 = arith.constant 0 : index
    %c0_1 = arith.constant 0 : index
    %0 = vector.load %arg1[%c0, %c0_0, %c0_1] : memref<2x4x256xf32, #tpu.memory_space<vmem>>, vector<1x4x256xf32>
    %1 = vector.shape_cast %0 : vector<1x4x256xf32> to vector<4x256xf32>
    %c0_2 = arith.constant 0 : index
    %c0_3 = arith.constant 0 : index
    %2 = vector.load %arg10[%c0_2, %c0_3] : memref<4x512xf32, #tpu.memory_space<vmem>>, vector<4x256xf32>
    tpu.vector_store %arg10[%c0_2, %c0_3], %1 {strides = array<i32>} : memref<4x512xf32, #tpu.memory_space<vmem>>, vector<4x256xf32>,
    %c1 = arith.constant 1 : index
    %c0_4 = arith.constant 0 : index
    %c0_5 = arith.constant 0 : index
    %3 = vector.load %arg1[%c1, %c0_4, %c0_5] : memref<2x4x256xf32, #tpu.memory_space<vmem>>, vector<1x4x256xf32>
    %4 = vector.shape_cast %3 : vector<1x4x256xf32> to vector<4x256xf32>
    %c0_6 = arith.constant 0 : index
    %c256 = arith.constant 256 : index
    %5 = vector.load %arg10[%c0_6, %c256] : memref<4x512xf32, #tpu.memory_space<vmem>>, vector<4x256xf32>
    tpu.vector_store %arg10[%c0_6, %c256], %4 {strides = array<i32>} : memref<4x512xf32, #tpu.memory_space<vmem>>, vector<4x256xf32>,
    %c0_7 = arith.constant 0 : index
    %c0_8 = arith.constant 0 : index
    %6 = vector.load %arg10[%c0_7, %c0_8] : memref<4x512xf32, #tpu.memory_space<vmem>>, vector<4x512xf32>
    %c0_9 = arith.constant 0 : index
    %c0_10 = arith.constant 0 : index
    %7 = vector.load %arg2[%c0_9, %c0_10] : memref<4x512xf32, #tpu.memory_space<vmem>>, vector<1x512xf32>
    %8 = vector.shape_cast %7 : vector<1x512xf32> to vector<1x512xf32>
    %9 = vector.broadcast %8 : vector<1x512xf32> to vector<8x512xf32>
    %cst = arith.constant 5.000000e-01 : f32
    %10 = vector.broadcast %cst : f32 to vector<8x512xf32>
    %11 = arith.cmpf ogt, %9, %10 : vector<8x512xf32>
    %c1_11 = arith.constant 1 : index
    %c0_12 = arith.constant 0 : index
    %12 = vector.load %arg2[%c1_11, %c0_12] : memref<4x512xf32, #tpu.memory_space<vmem>>, vector<1x512xf32>
    %13 = vector.shape_cast %12 : vector<1x512xf32> to vector<1x512xf32>
    %14 = vector.broadcast %13 : vector<1x512xf32> to vector<8x512xf32>
    %cst_13 = arith.constant 5.000000e-01 : f32
    %15 = vector.broadcast %cst_13 : f32 to vector<8x512xf32>
    %16 = arith.cmpf ogt, %14, %15 : vector<8x512xf32>
    %c2 = arith.constant 2 : index
    %c0_14 = arith.constant 0 : index
    %17 = vector.load %arg2[%c2, %c0_14] : memref<4x512xf32, #tpu.memory_space<vmem>>, vector<1x512xf32>
    %18 = vector.shape_cast %17 : vector<1x512xf32> to vector<1x512xf32>
    %19 = vector.broadcast %18 : vector<1x512xf32> to vector<8x512xf32>
    %cst_15 = arith.constant 5.000000e-01 : f32
    %20 = vector.broadcast %cst_15 : f32 to vector<8x512xf32>
    %21 = arith.cmpf ogt, %19, %20 : vector<8x512xf32>
    %c3 = arith.constant 3 : index
    %c0_16 = arith.constant 0 : index
    %22 = vector.load %arg2[%c3, %c0_16] : memref<4x512xf32, #tpu.memory_space<vmem>>, vector<1x512xf32>
    %23 = vector.shape_cast %22 : vector<1x512xf32> to vector<1x512xf32>
    %24 = vector.broadcast %23 : vector<1x512xf32> to vector<8x512xf32>
    %cst_17 = arith.constant 5.000000e-01 : f32
    %25 = vector.broadcast %cst_17 : f32 to vector<8x512xf32>
    %26 = arith.cmpf ogt, %24, %25 : vector<8x512xf32>
    %c0_18 = arith.constant 0 : index
    %c0_19 = arith.constant 0 : index
    %27 = vector.load %arg3[%c0_18, %c0_19] : memref<8x4xf32, #tpu.memory_space<vmem>>, vector<8x4xf32>
    %cst_20 = arith.constant dense<0.000000e+00> : vector<8x512xf32>
    %28 = tpu.matmul %27, %6, %cst_20 {dimension_numbers = #tpu.dot_dimension_numbers<[1], [0], [0], [1], [0, 0, 1, 1], [], []>} : vector<8x4xf32>, vector<4x512xf32>, vector<8x512xf32> -> vector<8x512xf32>
    %c0_21 = arith.constant 0 : index
    %c0_22 = arith.constant 0 : index
    %29 = vector.load %arg4[%c0_21, %c0_22] : memref<8x1xf32, #tpu.memory_space<vmem>>, vector<8x1xf32>
    %30 = vector.broadcast %29 : vector<8x1xf32> to vector<8x512xf32>
    %31 = arith.addf %28, %30 : vector<8x512xf32>
    %cst_23 = arith.constant 5.000000e-01 : f32
    %32 = vector.broadcast %cst_23 : f32 to vector<8x512xf32>
    %33 = arith.mulf %32, %31 : vector<8x512xf32>
    %cst_24 = arith.constant 0.707106769 : f32
    %34 = vector.broadcast %cst_24 : f32 to vector<8x512xf32>
    %35 = arith.mulf %31, %34 : vector<8x512xf32>
    %cst_25 = arith.constant -4.000000e+00 : f32
    %cst_26 = arith.constant 4.000000e+00 : f32
    %36 = vector.broadcast %cst_25 : f32 to vector<8x512xf32>
    %37 = arith.maximumf %36, %35 : vector<8x512xf32>
    %38 = vector.broadcast %cst_26 : f32 to vector<8x512xf32>
    %39 = arith.minimumf %38, %37 : vector<8x512xf32>
    %40 = arith.mulf %39, %39 : vector<8x512xf32>
    %cst_27 = arith.constant -2.72614237E-10 : f32
    %41 = vector.broadcast %cst_27 : f32 to vector<8x512xf32>
    %42 = arith.mulf %41, %40 : vector<8x512xf32>
    %cst_28 = arith.constant 2.77068146E-8 : f32
    %43 = vector.broadcast %cst_28 : f32 to vector<8x512xf32>
    %44 = arith.addf %42, %43 : vector<8x512xf32>
    %45 = arith.mulf %44, %40 : vector<8x512xf32>
    %cst_29 = arith.constant -2.10102394E-6 : f32
    %46 = vector.broadcast %cst_29 : f32 to vector<8x512xf32>
    %47 = arith.addf %45, %46 : vector<8x512xf32>
    %48 = arith.mulf %47, %40 : vector<8x512xf32>
    %cst_30 = arith.constant -5.69250624E-5 : f32
    %49 = vector.broadcast %cst_30 : f32 to vector<8x512xf32>
    %50 = arith.addf %48, %49 : vector<8x512xf32>
    %51 = arith.mulf %50, %40 : vector<8x512xf32>
    %cst_31 = arith.constant -7.34990637E-4 : f32
    %52 = vector.broadcast %cst_31 : f32 to vector<8x512xf32>
    %53 = arith.addf %51, %52 : vector<8x512xf32>
    %54 = arith.mulf %53, %40 : vector<8x512xf32>
    %cst_32 = arith.constant -2.954600e-03 : f32
    %55 = vector.broadcast %cst_32 : f32 to vector<8x512xf32>
    %56 = arith.addf %54, %55 : vector<8x512xf32>
    %57 = arith.mulf %56, %40 : vector<8x512xf32>
    %cst_33 = arith.constant -0.0160960332 : f32
    %58 = vector.broadcast %cst_33 : f32 to vector<8x512xf32>
    %59 = arith.addf %57, %58 : vector<8x512xf32>
    %cst_34 = arith.constant -1.45660715E-5 : f32
    %60 = vector.broadcast %cst_34 : f32 to vector<8x512xf32>
    %61 = arith.mulf %60, %40 : vector<8x512xf32>
    %cst_35 = arith.constant -2.13374049E-4 : f32
    %62 = vector.broadcast %cst_35 : f32 to vector<8x512xf32>
    %63 = arith.addf %61, %62 : vector<8x512xf32>
    %64 = arith.mulf %63, %40 : vector<8x512xf32>
    %cst_36 = arith.constant -0.00168282702 : f32
    %65 = vector.broadcast %cst_36 : f32 to vector<8x512xf32>
    %66 = arith.addf %64, %65 : vector<8x512xf32>
    %67 = arith.mulf %66, %40 : vector<8x512xf32>
    %cst_37 = arith.constant -0.00737332925 : f32
    %68 = vector.broadcast %cst_37 : f32 to vector<8x512xf32>
    %69 = arith.addf %67, %68 : vector<8x512xf32>
    %70 = arith.mulf %69, %40 : vector<8x512xf32>
    %cst_38 = arith.constant -0.0142647391 : f32
    %71 = vector.broadcast %cst_38 : f32 to vector<8x512xf32>
    %72 = arith.addf %70, %71 : vector<8x512xf32>
    %73 = arith.mulf %39, %59 : vector<8x512xf32>
    %74 = tpu.reciprocal %72 {approx = true} : vector<8x512xf32> -> vector<8x512xf32>
    %75 = arith.mulf %73, %74 : vector<8x512xf32>
    %cst_39 = arith.constant 1.000000e+00 : f32
    %76 = vector.broadcast %cst_39 : f32 to vector<8x512xf32>
    %77 = arith.addf %76, %75 : vector<8x512xf32>
    %78 = arith.mulf %33, %77 : vector<8x512xf32>
    %c1_i32 = arith.constant 1 : i32
    %79 = tpu.dynamic_rotate %78 by %c1_i32 dim 1 : vector<8x512xf32>, i32 -> vector<8x512xf32>
    %80 = arith.select %11, %78, %79 : vector<8x512xi1>, vector<8x512xf32>
    %c511_i32 = arith.constant 511 : i32
    %81 = tpu.dynamic_rotate %78 by %c511_i32 dim 1 : vector<8x512xf32>, i32 -> vector<8x512xf32>
    %82 = arith.select %16, %78, %81 : vector<8x512xi1>, vector<8x512xf32>
    %c16_i32 = arith.constant 16 : i32
    %83 = tpu.dynamic_rotate %80 by %c16_i32 dim 1 : vector<8x512xf32>, i32 -> vector<8x512xf32>
    %84 = arith.select %21, %80, %83 : vector<8x512xi1>, vector<8x512xf32>
    %c0_40 = arith.constant 0 : index
    %c0_41 = arith.constant 0 : index
    %85 = vector.load %arg11[%c0_40, %c0_41] : memref<72x512xf32, #tpu.memory_space<vmem>>, vector<8x512xf32>
    tpu.vector_store %arg11[%c0_40, %c0_41], %84 {strides = array<i32>} : memref<72x512xf32, #tpu.memory_space<vmem>>, vector<8x512xf32>,
    %c16_i32_42 = arith.constant 16 : i32
    %86 = tpu.dynamic_rotate %78 by %c16_i32_42 dim 1 : vector<8x512xf32>, i32 -> vector<8x512xf32>
    %87 = arith.select %21, %78, %86 : vector<8x512xi1>, vector<8x512xf32>
    %c8 = arith.constant 8 : index
    %c0_43 = arith.constant 0 : index
    %88 = vector.load %arg11[%c8, %c0_43] : memref<72x512xf32, #tpu.memory_space<vmem>>, vector<8x512xf32>
    tpu.vector_store %arg11[%c8, %c0_43], %87 {strides = array<i32>} : memref<72x512xf32, #tpu.memory_space<vmem>>, vector<8x512xf32>,
    %c16_i32_44 = arith.constant 16 : i32
    %89 = tpu.dynamic_rotate %82 by %c16_i32_44 dim 1 : vector<8x512xf32>, i32 -> vector<8x512xf32>
    %90 = arith.select %21, %82, %89 : vector<8x512xi1>, vector<8x512xf32>
    %c16 = arith.constant 16 : index
    %c0_45 = arith.constant 0 : index
    %91 = vector.load %arg11[%c16, %c0_45] : memref<72x512xf32, #tpu.memory_space<vmem>>, vector<8x512xf32>
    tpu.vector_store %arg11[%c16, %c0_45], %90 {strides = array<i32>} : memref<72x512xf32, #tpu.memory_space<vmem>>, vector<8x512xf32>,
    %c24 = arith.constant 24 : index
    %c0_46 = arith.constant 0 : index
    %92 = vector.load %arg11[%c24, %c0_46] : memref<72x512xf32, #tpu.memory_space<vmem>>, vector<8x512xf32>
    tpu.vector_store %arg11[%c24, %c0_46], %80 {strides = array<i32>} : memref<72x512xf32, #tpu.memory_space<vmem>>, vector<8x512xf32>,
    %c32 = arith.constant 32 : index
    %c0_47 = arith.constant 0 : index
    %93 = vector.load %arg11[%c32, %c0_47] : memref<72x512xf32, #tpu.memory_space<vmem>>, vector<8x512xf32>
    tpu.vector_store %arg11[%c32, %c0_47], %78 {strides = array<i32>} : memref<72x512xf32, #tpu.memory_space<vmem>>, vector<8x512xf32>,
    %c40 = arith.constant 40 : index
    %c0_48 = arith.constant 0 : index
    %94 = vector.load %arg11[%c40, %c0_48] : memref<72x512xf32, #tpu.memory_space<vmem>>, vector<8x512xf32>
    tpu.vector_store %arg11[%c40, %c0_48], %82 {strides = array<i32>} : memref<72x512xf32, #tpu.memory_space<vmem>>, vector<8x512xf32>,
    %c496_i32 = arith.constant 496 : i32
    %95 = tpu.dynamic_rotate %80 by %c496_i32 dim 1 : vector<8x512xf32>, i32 -> vector<8x512xf32>
    %96 = arith.select %26, %80, %95 : vector<8x512xi1>, vector<8x512xf32>
    %c48 = arith.constant 48 : index
    %c0_49 = arith.constant 0 : index
    %97 = vector.load %arg11[%c48, %c0_49] : memref<72x512xf32, #tpu.memory_space<vmem>>, vector<8x512xf32>
    tpu.vector_store %arg11[%c48, %c0_49], %96 {strides = array<i32>} : memref<72x512xf32, #tpu.memory_space<vmem>>, vector<8x512xf32>,
    %c496_i32_50 = arith.constant 496 : i32
    %98 = tpu.dynamic_rotate %78 by %c496_i32_50 dim 1 : vector<8x512xf32>, i32 -> vector<8x512xf32>
    %99 = arith.select %26, %78, %98 : vector<8x512xi1>, vector<8x512xf32>
    %c56 = arith.constant 56 : index
    %c0_51 = arith.constant 0 : index
    %100 = vector.load %arg11[%c56, %c0_51] : memref<72x512xf32, #tpu.memory_space<vmem>>, vector<8x512xf32>
    tpu.vector_store %arg11[%c56, %c0_51], %99 {strides = array<i32>} : memref<72x512xf32, #tpu.memory_space<vmem>>, vector<8x512xf32>,
    %c496_i32_52 = arith.constant 496 : i32
    %101 = tpu.dynamic_rotate %82 by %c496_i32_52 dim 1 : vector<8x512xf32>, i32 -> vector<8x512xf32>
    %102 = arith.select %26, %82, %101 : vector<8x512xi1>, vector<8x512xf32>
    %c64 = arith.constant 64 : index
    %c0_53 = arith.constant 0 : index
    %103 = vector.load %arg11[%c64, %c0_53] : memref<72x512xf32, #tpu.memory_space<vmem>>, vector<8x512xf32>
    tpu.vector_store %arg11[%c64, %c0_53], %102 {strides = array<i32>} : memref<72x512xf32, #tpu.memory_space<vmem>>, vector<8x512xf32>,
    %c0_54 = arith.constant 0 : index
    %c0_55 = arith.constant 0 : index
    %104 = vector.load %arg5[%c0_54, %c0_55] : memref<8x72xf32, #tpu.memory_space<vmem>>, vector<8x72xf32>
    %c0_56 = arith.constant 0 : index
    %c0_57 = arith.constant 0 : index
    %105 = vector.load %arg11[%c0_56, %c0_57] : memref<72x512xf32, #tpu.memory_space<vmem>>, vector<72x512xf32>
    %cst_58 = arith.constant dense<0.000000e+00> : vector<8x512xf32>
    %106 = tpu.matmul %104, %105, %cst_58 {dimension_numbers = #tpu.dot_dimension_numbers<[1], [0], [0], [1], [0, 0, 1, 1], [], []>} : vector<8x72xf32>, vector<72x512xf32>, vector<8x512xf32> -> vector<8x512xf32>
    %c0_59 = arith.constant 0 : index
    %c0_60 = arith.constant 0 : index
    %107 = vector.load %arg6[%c0_59, %c0_60] : memref<8x1xf32, #tpu.memory_space<vmem>>, vector<8x1xf32>
    %108 = vector.broadcast %107 : vector<8x1xf32> to vector<8x512xf32>
    %109 = arith.addf %106, %108 : vector<8x512xf32>
    %cst_61 = arith.constant 5.000000e-01 : f32
    %110 = vector.broadcast %cst_61 : f32 to vector<8x512xf32>
    %111 = arith.mulf %110, %109 : vector<8x512xf32>
    %cst_62 = arith.constant 0.707106769 : f32
    %112 = vector.broadcast %cst_62 : f32 to vector<8x512xf32>
    %113 = arith.mulf %109, %112 : vector<8x512xf32>
    %cst_63 = arith.constant -4.000000e+00 : f32
    %cst_64 = arith.constant 4.000000e+00 : f32
    %114 = vector.broadcast %cst_63 : f32 to vector<8x512xf32>
    %115 = arith.maximumf %114, %113 : vector<8x512xf32>
    %116 = vector.broadcast %cst_64 : f32 to vector<8x512xf32>
    %117 = arith.minimumf %116, %115 : vector<8x512xf32>
    %118 = arith.mulf %117, %117 : vector<8x512xf32>
    %cst_65 = arith.constant -2.72614237E-10 : f32
    %119 = vector.broadcast %cst_65 : f32 to vector<8x512xf32>
    %120 = arith.mulf %119, %118 : vector<8x512xf32>
    %cst_66 = arith.constant 2.77068146E-8 : f32
    %121 = vector.broadcast %cst_66 : f32 to vector<8x512xf32>
    %122 = arith.addf %120, %121 : vector<8x512xf32>
    %123 = arith.mulf %122, %118 : vector<8x512xf32>
    %cst_67 = arith.constant -2.10102394E-6 : f32
    %124 = vector.broadcast %cst_67 : f32 to vector<8x512xf32>
    %125 = arith.addf %123, %124 : vector<8x512xf32>
    %126 = arith.mulf %125, %118 : vector<8x512xf32>
    %cst_68 = arith.constant -5.69250624E-5 : f32
    %127 = vector.broadcast %cst_68 : f32 to vector<8x512xf32>
    %128 = arith.addf %126, %127 : vector<8x512xf32>
    %129 = arith.mulf %128, %118 : vector<8x512xf32>
    %cst_69 = arith.constant -7.34990637E-4 : f32
    %130 = vector.broadcast %cst_69 : f32 to vector<8x512xf32>
    %131 = arith.addf %129, %130 : vector<8x512xf32>
    %132 = arith.mulf %131, %118 : vector<8x512xf32>
    %cst_70 = arith.constant -2.954600e-03 : f32
    %133 = vector.broadcast %cst_70 : f32 to vector<8x512xf32>
    %134 = arith.addf %132, %133 : vector<8x512xf32>
    %135 = arith.mulf %134, %118 : vector<8x512xf32>
    %cst_71 = arith.constant -0.0160960332 : f32
    %136 = vector.broadcast %cst_71 : f32 to vector<8x512xf32>
    %137 = arith.addf %135, %136 : vector<8x512xf32>
    %cst_72 = arith.constant -1.45660715E-5 : f32
    %138 = vector.broadcast %cst_72 : f32 to vector<8x512xf32>
    %139 = arith.mulf %138, %118 : vector<8x512xf32>
    %cst_73 = arith.constant -2.13374049E-4 : f32
    %140 = vector.broadcast %cst_73 : f32 to vector<8x512xf32>
    %141 = arith.addf %139, %140 : vector<8x512xf32>
    %142 = arith.mulf %141, %118 : vector<8x512xf32>
    %cst_74 = arith.constant -0.00168282702 : f32
    %143 = vector.broadcast %cst_74 : f32 to vector<8x512xf32>
    %144 = arith.addf %142, %143 : vector<8x512xf32>
    %145 = arith.mulf %144, %118 : vector<8x512xf32>
    %cst_75 = arith.constant -0.00737332925 : f32
    %146 = vector.broadcast %cst_75 : f32 to vector<8x512xf32>
    %147 = arith.addf %145, %146 : vector<8x512xf32>
    %148 = arith.mulf %147, %118 : vector<8x512xf32>
    %cst_76 = arith.constant -0.0142647391 : f32
    %149 = vector.broadcast %cst_76 : f32 to vector<8x512xf32>
    %150 = arith.addf %148, %149 : vector<8x512xf32>
    %151 = arith.mulf %117, %137 : vector<8x512xf32>
    %152 = tpu.reciprocal %150 {approx = true} : vector<8x512xf32> -> vector<8x512xf32>
    %153 = arith.mulf %151, %152 : vector<8x512xf32>
    %cst_77 = arith.constant 1.000000e+00 : f32
    %154 = vector.broadcast %cst_77 : f32 to vector<8x512xf32>
    %155 = arith.addf %154, %153 : vector<8x512xf32>
    %156 = arith.mulf %111, %155 : vector<8x512xf32>
    %c0_78 = arith.constant 0 : index
    %c0_79 = arith.constant 0 : index
    %157 = vector.load %arg7[%c0_78, %c0_79] : memref<4x8xf32, #tpu.memory_space<vmem>>, vector<4x8xf32>
    %cst_80 = arith.constant dense<0.000000e+00> : vector<4x512xf32>
    %158 = tpu.matmul %157, %156, %cst_80 {dimension_numbers = #tpu.dot_dimension_numbers<[1], [0], [0], [1], [0, 0, 1, 1], [], []>} : vector<4x8xf32>, vector<8x512xf32>, vector<4x512xf32> -> vector<4x512xf32>
    %c0_81 = arith.constant 0 : index
    %c0_82 = arith.constant 0 : index
    %159 = vector.load %arg8[%c0_81, %c0_82] : memref<4x1xf32, #tpu.memory_space<vmem>>, vector<4x1xf32>
    %160 = vector.broadcast %159 : vector<4x1xf32> to vector<4x512xf32>
    %161 = arith.addf %158, %160 : vector<4x512xf32>
    %162 = arith.addf %161, %6 : vector<4x512xf32>
    %163 = vector.extract_strided_slice %162 {offsets = [0, 0], sizes = [4, 256], strides = [1, 1]} : vector<4x512xf32> to vector<4x256xf32>
    %c0_83 = arith.constant 0 : index
    %c0_84 = arith.constant 0 : index
    %c0_85 = arith.constant 0 : index
    %164 = vector.load %arg9[%c0_83, %c0_84, %c0_85] : memref<2x4x256xf32, #tpu.memory_space<vmem>>, vector<1x4x256xf32>
    %165 = vector.shape_cast %164 : vector<1x4x256xf32> to vector<4x256xf32>
    %166 = vector.shape_cast %163 : vector<4x256xf32> to vector<1x4x256xf32>
    tpu.vector_store %arg9[%c0_83, %c0_84, %c0_85], %166 {strides = array<i32>} : memref<2x4x256xf32, #tpu.memory_space<vmem>>, vector<1x4x256xf32>,
    %167 = vector.extract_strided_slice %162 {offsets = [0, 256], sizes = [4, 256], strides = [1, 1]} : vector<4x512xf32> to vector<4x256xf32>
    %c1_86 = arith.constant 1 : index
    %c0_87 = arith.constant 0 : index
    %c0_88 = arith.constant 0 : index
    %168 = vector.load %arg9[%c1_86, %c0_87, %c0_88] : memref<2x4x256xf32, #tpu.memory_space<vmem>>, vector<1x4x256xf32>
    %169 = vector.shape_cast %168 : vector<1x4x256xf32> to vector<4x256xf32>
    %170 = vector.shape_cast %167 : vector<4x256xf32> to vector<1x4x256xf32>
    tpu.vector_store %arg9[%c1_86, %c0_87, %c0_88], %170 {strides = array<i32>} : memref<2x4x256xf32, #tpu.memory_space<vmem>>, vector<1x4x256xf32>,
    return
  }
  func.func @transform_0(%arg0: i32) -> (i32, i32, i32) {
    %c0_i32 = arith.constant 0 : i32
    %c0_i32_0 = arith.constant 0 : i32
    %c0_i32_1 = arith.constant 0 : i32
    return %arg0, %c0_i32, %c0_i32_0 : i32, i32, i32
  }
  func.func @transform_1(%arg0: i32) -> (i32, i32) {
    %c0_i32 = arith.constant 0 : i32
    %c0_i32_0 = arith.constant 0 : i32
    %c0_i32_1 = arith.constant 0 : i32
    return %c0_i32, %c0_i32_0 : i32, i32
  }
  func.func @transform_2(%arg0: i32) -> (i32, i32) {
    %c0_i32 = arith.constant 0 : i32
    %c0_i32_0 = arith.constant 0 : i32
    %c0_i32_1 = arith.constant 0 : i32
    return %c0_i32, %c0_i32_0 : i32, i32
  }
  func.func @transform_3(%arg0: i32) -> (i32, i32) {
    %c0_i32 = arith.constant 0 : i32
    %c0_i32_0 = arith.constant 0 : i32
    %c0_i32_1 = arith.constant 0 : i32
    return %c0_i32, %c0_i32_0 : i32, i32
  }
  func.func @transform_4(%arg0: i32) -> (i32, i32) {
    %c0_i32 = arith.constant 0 : i32
    %c0_i32_0 = arith.constant 0 : i32
    %c0_i32_1 = arith.constant 0 : i32
    return %c0_i32, %c0_i32_0 : i32, i32
  }
  func.func @transform_5(%arg0: i32) -> (i32, i32) {
    %c0_i32 = arith.constant 0 : i32
    %c0_i32_0 = arith.constant 0 : i32
    %c0_i32_1 = arith.constant 0 : i32
    return %c0_i32, %c0_i32_0 : i32, i32
  }
  func.func @transform_6(%arg0: i32) -> (i32, i32) {
    %c0_i32 = arith.constant 0 : i32
    %c0_i32_0 = arith.constant 0 : i32
    %c0_i32_1 = arith.constant 0 : i32
    return %c0_i32, %c0_i32_0 : i32, i32
  }
  func.func @transform_7(%arg0: i32) -> (i32, i32) {
    %c0_i32 = arith.constant 0 : i32
    %c0_i32_0 = arith.constant 0 : i32
    %c0_i32_1 = arith.constant 0 : i32
    return %c0_i32, %c0_i32_0 : i32, i32
  }
  func.func @transform_8(%arg0: i32) -> (i32, i32, i32) {
    %c0_i32 = arith.constant 0 : i32
    %c0_i32_0 = arith.constant 0 : i32
    %c0_i32_1 = arith.constant 0 : i32
    return %arg0, %c0_i32, %c0_i32_0 : i32, i32, i32
  }
}

</mosaic_0001>

<bundles_post_ra>
// kernel: tpu_custom_call.1
= control target key start
LH: loop header
LB: loop body
LE: loop exit
PB: predicated region body
PF: predicated region fallthrough
CT: control target
= control target key end

     0   :  { %13 = vsyncpa [#allocation5], 0  ;;  %s2486_s0 = inlined_call_operand.vmem [shape: f32[4,4,256], index: 0, kind: input, shape index: {}]   ;;  %s2487_s1 = inlined_call_operand.hbm [shape: f32[4,512], index: 1, kind: input, shape index: {}]   ;;  %s2488_s2 = inlined_call_operand.vmem [shape: f32[8,4], index: 2, kind: input, shape index: {}]   ;;  %s2489_s3 = inlined_call_operand.vmem [shape: f32[8,1], index: 3, kind: input, shape index: {}]   ;;  %s2490_s4 = inlined_call_operand.vmem [shape: f32[8,72], index: 4, kind: input, shape index: {}]   ;;  %s2491_s5 = inlined_call_operand.vmem [shape: f32[8,1], index: 5, kind: input, shape index: {}]   ;;  %s2492_s6 = inlined_call_operand.vmem [shape: f32[4,8], index: 6, kind: input, shape index: {}]   ;;  %s2493_s7 = inlined_call_operand.vmem [shape: f32[4,1], index: 7, kind: input, shape index: {}]   ;;  %s2494_s8 = inlined_call_operand.hbm [shape: f32[4,4,256], index: 8, kind: output, shape index: {}]  }
   0x1   :  { %14 = vsyncpa [#allocation6], 0 }
   0x2   :  { %16 = vsyncpa [#allocation6 + $0x1], 0  ;;  %s1823_s27 = smov 0   ;;  %s1825_s28 = smov 0  }
   0x3   :  { %s1827_s29 = smov 0   ;;  %s1829_s30 = smov 0  }
   0x4 LB: > { %s1844_s9 = sadd.s32 4294967295, %s1766_s30   ;;  %s1461_s10 = sadd.s32 4294967294, %s1766_s30   ;;  %s1766_s30 = sphi %s1829_s30, %s2536_s30   ;;  %s1762_s29 = sphi %s1827_s29, %s2535_s29   ;;  %s1758_s28 = sphi %s1825_s28, %s2534_s28   ;;  %s1754_s27 = sphi %s1823_s27, %s2533_s27  }
   0x5   : > { %s1848_s11 = sadd.s32 1, %s1766_s30   ;;  %s202_s12 = sadd.s32 1, %s1762_s29 }
   0x6   : > { %s199_s13 = ssub.s32 %s1766_s30, %s1848_s11  ;;  %p212_p0 = scmp.ne.s32.totalorder %s1762_s29, %s1758_s28 }
   0x7   : > { %p200_p1 = scmp.eq.s32.totalorder %s199_s13, 0  ;;  %p213_p2 = scmp.eq.s32.totalorder %s1844_s9, 1 }
   0x8   : > { %p218_p3 = scmp.ne.s32.totalorder %s1758_s28, %s1754_s27  ;;  %p219_p4 = scmp.eq.s32.totalorder %s1461_s10, 1 }
   0x9   : > { %s1859_s14 = scalar_select %p200_p1, %s1762_s29, %s202_s12  }
   0xa   : > { %p1861_p5 = por %p213_p2, %p212_p0  ;;  %p1865_p6 = por %p219_p4, %p218_p3 }
   0xb   : > { %p1462_p7 = scmp.ge.s32.totalorder %s1766_s30, 1  ;;  %p226_p8 = scmp.lt.s32.totalorder %s1766_s30, 3 }
   0xc   : > { %s2498_s15 = scalar_select %p1861_p5, 1, 0 }
   0xd   : > { %s2499_s16 = scalar_select %p1865_p6, 1, 0 }
   0xe   : > { %p2495_p9 = scmp.eq.s32.totalorder %s1844_s9, 0  ;;  %p1872_p10 = pnand %p1462_p7, %p226_p8 }
   0xf   : > { %s1768_s18 = smov [#allocation4]   ;;  %s1672_s23 = scalar_lea.hbm %s2487_s1, 256 }
  0x10   : > { %s2500_s17 = scalar_select %p1872_p10, 1, 0 }
  0x11   : > { %s239_s19 = sshll.u32 %s1768_s18, 4  ;;  %p1538_p11 = pneg %p1872_p10  ;;  %s240_s19 = int_to_ptr.vmem [resolvable:$true] %s239_s19 }
  0x12   : > { %p1673_p13 = scmp.ne.s32.totalorder %s2487_s1, %s1672_s23  ;;  %p1679_p3 = scmp.lt.u32.totalorder %s1672_s23, %s2487_s1 }
  0x13   : > { %p1880_p12 = pnand %p2495_p9, %p1538_p11 }
  0x15   : > { %p1674_p0 = pneg %p1880_p12 }
  0x17   : > { %p1675_p1 = pnand %p1674_p0, %p1673_p13 }
  0x19   : > { %p1676_p2 = pneg %p1675_p1 }
  0x1b   : > { %p1681_p4 = pnand %p1679_p3, %p1676_p2 }
  0x1d   : > { %1684 = shalt.err (!%p1681_p4)
}
  0x1e   : > { %s1685_s12 = scalar_lea.vmem %s240_s19, 256  ;;  %p1693_p9 = scmp.lt.s32.totalorder %s240_s19, %s240_s19 }
  0x1f   : > { %p1686_p7 = scmp.ne.s32.totalorder %s240_s19, %s1685_s12  ;;  %p1694_p6 = scmp.lt.s32.totalorder %s1685_s12, %s1685_s12 }
  0x21   : > { %p1688_p8 = pnand %p1686_p7, %p1674_p0  ;;  %p1695_p5 = por %p1694_p6, %p1693_p9 }
  0x23   : > { %p1689_p11 = pneg %p1688_p8 }
  0x25   : > { %p1696_p10 = pnand %p1695_p5, %p1689_p11 }
  0x27   : > { %1699 = shalt.err (!%p1696_p10)
}
  0x28   : > { %1541 = dma.hbm_to_vmem [thread:$0]  (!%p1880_p12), %s2487_s1, 256, %s240_s19, [#allocation5]  }
  0x29   : > { %p2502_p13 = scmp.ne.s32.totalorder %s2500_s17, 0 }
  0x2a   : > { %p2503_p1 = scmp.eq.s32.totalorder (!%p2502_p13), %s1844_s9, 0 }
  0x2b   : > { %280 = sbr.rel (%p2502_p13) target bundleno = 1079 (0x437), region = 52 }
  0x32   : > { %1745 = dma.done.wait (%p2503_p1), [#allocation5], 256   ;;  %p2504_p0 = pmov %p2503_p1 }
  0x33   : > { %s1468_s21 = sshll.u32 %s1844_s9, 1  ;;  %v1769_v0 = vmov 0.0   ;;  %v1770_v1 = vmov 0   ;;  %vm452_vm0 = vcmask 1043456   ;;  %v438_v6 = vld [vmem:[%s2489_s3] sm:$0xff]  ;;  %vm448_vm1 = vcmask 31744  }
  0x34   : > { %1747 = vsyncadd (%p2504_p0), [#allocation5], 4294967040  ;;  %p316_p6 = scmp.lt.s32.totalorder %s1468_s21, 3  ;;  %525 = vmatprep.mubr.f32.mxu0 %v1769_v0  ;;  %596 = vmatprep.mubr.f32.mxu1 %v1769_v0  ;;  %v437_v7 = vld [vmem:[%s2488_s2] sm:$0xff]  ;;  %s1771_s10 = smov 127  }
  0x35   : > { %1590 = vset.pattern.permute.xlu0 %v1770_v1  ;;  %1651 = vset.pattern.permute.xlu1 %v1770_v1  ;;  %s1772_s12 = smov 1   ;;  %s1773_s13 = smov 16  }
  0x36   : > { %s2538_s21 = smov (!%p316_p6, %s1468_s21), 3  ;;  %441 = vperm.xlu0 %1590, %v438_v6   ;;  %s1774_s18 = smov 112  }
  0x37   : > { %s1497_s17 = sshll.u32 %s2538_s21, 3  ;;  %s1499_s21 = sshll.u32 %s1844_s9, 8 }
  0x38   : > { %s1912_s22 = scalar_lea.vmem %s2486_s0, %s1497_s17  ;;  %s2443_s20 = scalar_lea.hbm %s2494_s8, %s1499_s21 }
  0x39   : > { %v323_v2 = vld [vmem:[%s1912_s22] sm:$0xff]  ;;  %v1471_v3 = vld [vmem:[%s1912_s22 + $0x8] sm:$0xff]  ;;  %p2531_p9 = scmp.ne.s32.totalorder %s2498_s15, 0 }
  0x3a   : > { %v1916_v4 = vcombine.high %v323_v2, %v323_v2  ;;  %v1918_v5 = vcombine.high %v1471_v3, %v1471_v3 }
  0x3c   : > { %1472 = vmatprep.subr.msk.mxu0 %vm452_vm0, %v1916_v4  ;;  %1475 = vmatprep.subr.msk.mxu1 %vm452_vm0, %v1918_v5 }
  0x3d   : > { %1473 = vmatpush1.msk.msra.mxu0 %vm452_vm0, %v323_v2  ;;  %1476 = vmatpush1.msk.msra.mxu1 %vm452_vm0, %v1471_v3 }
  0x3e   : > { %1474 = vmatmul.mubr.msk.f32.vlgmr.msra.gmra.mrb[0].mxu0 %vm448_vm1, %v437_v7  ;;  %1477 = vmatmul.mubr.msk.f32.vlgmr.msra.gmra.mrb[0].mxu1 %vm448_vm1, %v437_v7 }
  0x3f   : > { %1004 = vmatprep.mubr.f32.mxu0 %v1769_v0  ;;  %1075 = vmatprep.mubr.f32.mxu1 %v1769_v0 }
  0xb5   : > { %v442_v8 = vpop.permute.xlu0 %441 }
 0x111   : > { %v527_v9 = vpop.f32.mrb[0].mxu0  ;;  %v598_v10 = vpop.f32.mrb[0].mxu1 }
 0x112   : > { %v1930_v11 = vadd.f32 %v527_v9, %v442_v8  ;;  %v1932_v12 = vadd.f32 %v598_v10, %v442_v8  ;;  %v529_v13 = vpop.f32.mrb[1].mxu0  ;;  %v600_v14 = vpop.f32.mrb[1].mxu1 }
 0x113   : > { %v1934_v15 = vadd.f32 %v529_v13, %v442_v8  ;;  %v1936_v16 = vadd.f32 %v600_v14, %v442_v8 }
 0x114   : > { %v607_v17 = vmul.f32 0.70710677, %v1930_v11  ;;  %v609_v18 = vmul.f32 0.70710677, %v1932_v12 }
 0x115   : > { %v608_v19 = vmul.f32 0.70710677, %v1934_v15  ;;  %v610_v20 = vmul.f32 0.70710677, %v1936_v16 }
 0x116   : > { %v1942_v21 = vclamps-f32 %v607_v17, 4.0  ;;  %v1944_v22 = vclamps-f32 %v609_v18, 4.0 }
 0x117   : > { %v1946_v23 = vclamps-f32 %v608_v19, 4.0  ;;  %v1948_v24 = vclamps-f32 %v610_v20, 4.0 }
 0x118   : > { %v1952_v25 = vmul.f32 %v1942_v21, %v1942_v21  ;;  %v1956_v26 = vmul.f32 %v1944_v22, %v1944_v22 }
 0x119   : > { %v1960_v27 = vmul.f32 %v1946_v23, %v1946_v23  ;;  %v1967_v31 = vmul.f32 %v1948_v24, %v1948_v24 }
 0x11a   : > { %v623_v28 = vmul.f32 -2.7261424e-10, %v1952_v25  ;;  %v671_v29 = vmul.f32 -1.45660715e-05, %v1952_v25  ;;  %v625_v30 = vmul.f32 -2.7261424e-10, %v1956_v26 }
 0x11b   : > { %v673_v32 = vmul.f32 -1.45660715e-05, %v1956_v26  ;;  %v624_v33 = vmul.f32 -2.7261424e-10, %v1960_v27  ;;  %v672_v34 = vmul.f32 -1.45660715e-05, %v1960_v27 }
 0x11c   : > { %v627_v35 = vadd.f32 2.7706815e-08, %v623_v28  ;;  %v675_v36 = vadd.f32 -0.00021337405, %v671_v29  ;;  %v629_v37 = vadd.f32 2.7706815e-08, %v625_v30 }
 0x11d   : > { %v677_v38 = vadd.f32 -0.00021337405, %v673_v32  ;;  %v628_v39 = vadd.f32 2.7706815e-08, %v624_v33  ;;  %v676_v40 = vadd.f32 -0.00021337405, %v672_v34 }
 0x11e   : > { %v631_v41 = vmul.f32 %v627_v35, %v1952_v25  ;;  %v679_v42 = vmul.f32 %v675_v36, %v1952_v25  ;;  %v633_v43 = vmul.f32 %v629_v37, %v1956_v26  ;;  %v626_v44 = vmul.f32 -2.7261424e-10, %v1967_v31 }
 0x11f   : > { %v681_v45 = vmul.f32 %v677_v38, %v1956_v26  ;;  %v632_v46 = vmul.f32 %v628_v39, %v1960_v27  ;;  %v680_v47 = vmul.f32 %v676_v40, %v1960_v27  ;;  %v674_v48 = vmul.f32 -1.45660715e-05, %v1967_v31 }
 0x120   : > { %v635_v49 = vadd.f32 -2.101024e-06, %v631_v41  ;;  %v683_v50 = vadd.f32 -0.001682827, %v679_v42  ;;  %v637_v51 = vadd.f32 -2.101024e-06, %v633_v43 }
 0x121   : > { %v685_v52 = vadd.f32 -0.001682827, %v681_v45  ;;  %v636_v53 = vadd.f32 -2.101024e-06, %v632_v46  ;;  %v684_v54 = vadd.f32 -0.001682827, %v680_v47 }
 0x122   : > { %v639_v55 = vmul.f32 %v635_v49, %v1952_v25  ;;  %v687_v56 = vmul.f32 %v683_v50, %v1952_v25  ;;  %v641_v57 = vmul.f32 %v637_v51, %v1956_v26  ;;  %v630_v58 = vadd.f32 2.7706815e-08, %v626_v44 }
 0x123   : > { %v689_v59 = vmul.f32 %v685_v52, %v1956_v26  ;;  %v640_v60 = vmul.f32 %v636_v53, %v1960_v27  ;;  %v688_v61 = vmul.f32 %v684_v54, %v1960_v27  ;;  %v678_v62 = vadd.f32 -0.00021337405, %v674_v48 }
 0x124   : > { %v643_v63 = vadd.f32 -5.6925062e-05, %v639_v55  ;;  %v691_v1 = vadd.f32 -0.0073733293, %v687_v56  ;;  %v645_v2 = vadd.f32 -5.6925062e-05, %v641_v57  ;;  %v634_v3 = vmul.f32 %v630_v58, %v1967_v31 }
 0x125   : > { %v693_v6 = vadd.f32 -0.0073733293, %v689_v59  ;;  %v644_v7 = vadd.f32 -5.6925062e-05, %v640_v60  ;;  %v692_v8 = vadd.f32 -0.0073733293, %v688_v61  ;;  %v682_v9 = vmul.f32 %v678_v62, %v1967_v31 }
 0x126   : > { %v647_v10 = vmul.f32 %v643_v63, %v1952_v25  ;;  %v695_v13 = vmul.f32 %v691_v1, %v1952_v25  ;;  %v649_v14 = vmul.f32 %v645_v2, %v1956_v26  ;;  %v638_v17 = vadd.f32 -2.101024e-06, %v634_v3 }
 0x127   : > { %v697_v18 = vmul.f32 %v693_v6, %v1956_v26  ;;  %v648_v19 = vmul.f32 %v644_v7, %v1960_v27  ;;  %v696_v20 = vmul.f32 %v692_v8, %v1960_v27  ;;  %v686_v28 = vadd.f32 -0.001682827, %v682_v9 }
 0x128   : > { %v651_v29 = vadd.f32 -0.00073499064, %v647_v10  ;;  %v699_v30 = vadd.f32 -0.014264739, %v695_v13  ;;  %v653_v32 = vadd.f32 -0.00073499064, %v649_v14  ;;  %v642_v33 = vmul.f32 %v638_v17, %v1967_v31 }
 0x129   : > { %v701_v34 = vadd.f32 -0.014264739, %v697_v18  ;;  %v652_v35 = vadd.f32 -0.00073499064, %v648_v19  ;;  %v700_v36 = vadd.f32 -0.014264739, %v696_v20  ;;  %v690_v37 = vmul.f32 %v686_v28, %v1967_v31 }
 0x12a   : > { %v655_v38 = vmul.f32 %v651_v29, %v1952_v25  ;;  %1654 = vrcp.f32 %v699_v30  ;;  %v657_v39 = vmul.f32 %v653_v32, %v1956_v26  ;;  %v646_v40 = vadd.f32 -5.6925062e-05, %v642_v33  ;;  %v330_v28 = vld [vmem:[#allocation4] ss:$4 sm:$0xf] }
 0x12b   : > { %1656 = vrcp.f32 %v701_v34  ;;  %v656_v41 = vmul.f32 %v652_v35, %v1960_v27  ;;  %v694_v42 = vadd.f32 -0.0073733293, %v690_v37  ;;  %v603_v2 = vmul.f32 0.5, %v1930_v11  ;;  %v357_v34 = vld [vmem:[#allocation4 + $0x1] ss:$4 sm:$0xf] }
 0x12c   : > { %v659_v43 = vadd.f32 -0.0029546, %v655_v38  ;;  %v661_v44 = vadd.f32 -0.0029546, %v657_v39  ;;  %1658 = vrcp.f32 %v700_v36  ;;  %v650_v45 = vmul.f32 %v646_v40, %v1967_v31 }
 0x12d   : > { %v660_v46 = vadd.f32 -0.0029546, %v656_v41  ;;  %v698_v47 = vmul.f32 %v694_v42, %v1967_v31  ;;  %v606_v14 = vmul.f32 0.5, %v1936_v16 }
 0x12e   : > { %v663_v48 = vmul.f32 %v659_v43, %v1952_v25  ;;  %v665_v49 = vmul.f32 %v661_v44, %v1956_v26  ;;  %v654_v50 = vadd.f32 -0.00073499064, %v650_v45 }
 0x12f   : > { %v664_v51 = vmul.f32 %v660_v46, %v1960_v27  ;;  %v702_v52 = vadd.f32 -0.014264739, %v698_v47 }
 0x130   : > { %v667_v53 = vadd.f32 -0.016096033, %v663_v48  ;;  %v669_v54 = vadd.f32 -0.016096033, %v665_v49  ;;  %v658_v55 = vmul.f32 %v654_v50, %v1967_v31 }
 0x131   : > { %v668_v56 = vadd.f32 -0.016096033, %v664_v51  ;;  %1660 = vrcp.f32 %v702_v52 }
 0x132   : > { %v703_v57 = vmul.f32 %v1942_v21, %v667_v53  ;;  %v705_v58 = vmul.f32 %v1944_v22, %v669_v54  ;;  %v662_v59 = vadd.f32 -0.0029546, %v658_v55  ;;  %v604_v22 = vmul.f32 0.5, %v1934_v15 }
 0x133   : > { %v704_v60 = vmul.f32 %v1946_v23, %v668_v56 }
 0x134   : > { %v1655_v25 = vpop.eup %1654  ;;  %v666_v26 = vmul.f32 %v662_v59, %v1967_v31  ;;  %v605_v31 = vmul.f32 0.5, %v1932_v12  ;;  %v332_v12 = vlaneseq }
 0x135   : > { %v1657_v61 = vpop.eup %1656  ;;  %v711_v62 = vmul.f32 %v1655_v25, %v703_v57 }
 0x136   : > { %v1659_v27 = vpop.eup %1658  ;;  %v713_v63 = vmul.f32 %v1657_v61, %v705_v58  ;;  %v670_v1 = vadd.f32 -0.016096033, %v666_v26  ;;  %v333_v16 = vshrl.u32 %v332_v12, 7  ;;  %v2042_v20 = vand.u32 127, %v332_v12 }
 0x137   : > { %v715_v3 = vadd.f32 1.0, %v711_v62  ;;  %v712_v6 = vmul.f32 %v1659_v27, %v704_v60 }
 0x138   : > { %v706_v7 = vmul.f32 %v1948_v24, %v670_v1  ;;  %v717_v23 = vadd.f32 1.0, %v713_v63  ;;  %v2040_v19 = vsub.s32 1, %v333_v16  ;;  %v2044_v29 = vsub.s32 0, %v333_v16 }
 0x139   : > { %v2011_v21 = vmul.f32 %v715_v3, %v603_v2  ;;  %v716_v8 = vadd.f32 1.0, %v712_v6  ;;  %v2046_v30 = vsub.s32 2, %v333_v16  ;;  %v2048_v32 = vsub.s32 3, %v333_v16 }
 0x13a   : > { %v2022_v24 = vmul.f32 %v717_v23, %v605_v31  ;;  %v339_v35 = vrot.slane %v330_v28, %v2040_v19  ;;  %vm733_vm2 = vcmp.lt.s32.totalorder %v2042_v20, 1  ;;  %v335_v39 = vrot.slane %v330_v28, %v2044_v29 }
 0x13b   : > { %v1661_v9 = vpop.eup %1660  ;;  %v2014_v10 = vmul.f32 %v716_v8, %v604_v22  ;;  %742 = vrot.lane.b32.xlu1 %v2011_v21, %s1771_s10  ;;  %v343_v40 = vrot.slane %v330_v28, %v2046_v30  ;;  %v347_v41 = vrot.slane %v330_v28, %v2048_v32  ;;  %v362_v42 = vrot.slane %v357_v34, %v2044_v29 }
 0x13c   : > { %v714_v13 = vmul.f32 %v1661_v9, %v706_v7  ;;  %v366_v43 = vrot.slane %v357_v34, %v2040_v19  ;;  %v370_v44 = vrot.slane %v357_v34, %v2046_v30  ;;  %v374_v45 = vrot.slane %v357_v34, %v2048_v32 }
 0x13d   : > { %v2020_v11 = vpack.i.bf16 %v2014_v10, %v2011_v21  ;;  %vm353_vm3 = vcmp.gt.f32.partialorder %v339_v35, 0.5  ;;  %vm2061_vm4 = vcmp.gt.f32.partialorder %v335_v39, 0.5  ;;  %vm2065_vm5 = vcmp.gt.f32.partialorder %v343_v40, 0.5 }
 0x13e   : > { %v718_v15 = vadd.f32 1.0, %v714_v13  ;;  %vm750_vm6 = vcmp.lt.s32.totalorder %v2042_v20, 127  ;;  %vm355_vm7 = vcmp.gt.f32.partialorder %v347_v41, 0.5  ;;  %vm2070_vm8 = vcmp.gt.f32.partialorder %v362_v42, 0.5  ;;  %v1203_v13 = vld [vmem:[%s2493_s7] sm:$0xf] }
 0x13f   : > { %1592 = vrot.lane.b32.xlu0 %v2020_v11, %s1772_s12  ;;  %vm2077_vm9 = vcmp.gt.f32.partialorder %v366_v43, 0.5  ;;  %vm2081_vm10 = vcmp.gt.f32.partialorder %v370_v44, 0.5  ;;  %vm382_vm11 = vcmp.gt.f32.partialorder %v374_v45, 0.5  ;;  %vm767_vm12 = vcmp.lt.s32.totalorder %v2042_v20, 16 }
 0x140   : > { %v2026_v17 = vmul.f32 %v718_v15, %v606_v14  ;;  %v384_v14 = vld [vmem:[#allocation4 + $0x2] ss:$4 sm:$0xf]  ;;  %vm840_vm1 = vcmp.lt.s32.totalorder %v2042_v20, 112 }
 0x141   : > { %v393_v12 = vrot.slane %v384_v14, %v2040_v19  ;;  %v401_v16 = vrot.slane %v384_v14, %v2048_v32  ;;  %v389_v28 = vrot.slane %v384_v14, %v2044_v29 }
 0x142   : > { %v2030_v18 = vpack.i.bf16 %v2026_v17, %v2022_v24 }
 0x143   : > { %744 = vrot.lane.b32.xlu0 %v2014_v10, %s1771_s10  ;;  %vm2161_vm13 = vcmp.gt.f32.partialorder %v393_v12, 0.5  ;;  %vm2165_vm14 = vcmp.gt.f32.partialorder %v401_v16, 0.5  ;;  %vm2169_vm15 = vcmp.gt.f32.partialorder %v389_v28, 0.5 }
 0x144   : > { %1597 = vrot.lane.b32.xlu1 %v2030_v18, %s1772_s12 }
 0x147   : > { %748 = vrot.lane.b32.xlu0 %v2026_v17, %s1771_s10 }
 0x148   : > { %746 = vrot.lane.b32.xlu1 %v2022_v24, %s1771_s10  ;;  %s312_s10 = sand.u32 1, %s1758_s28  }
 0x149   : > { %s1467_s12 = sshll.u32 %s312_s10, 4  ;;  %s2445_s23 = scalar_lea.sflag [#allocation6], %s312_s10 }
 0x14b   : > { %1607 = vrot.lane.b32.xlu0 %v2030_v18, %s1773_s13 }
 0x14c   : > { %1602 = vrot.lane.b32.xlu1 %v2020_v11, %s1773_s13 }
 0x1ad   : > { %v743_v33 = vpop.permute.xlu1 %742 }
 0x1b1   : > { %v1593_v36 = vpop.permute.xlu0 %1592 }
 0x1b2   : > { %v1595_v37 = vunpack.i.h.bf16 %v1593_v36  ;;  %v1594_v38 = vunpack.i.l.bf16 %v1593_v36 }
 0x1b4   : > { %v736_v46 = vsel %vm733_vm2, %v1594_v38, %v1595_v37 }
 0x1b5   : > { %v745_v47 = vpop.permute.xlu0 %744  ;;  %v2075_v54 = vsel %vm353_vm3, %v2014_v10, %v736_v46 }
 0x1b6   : > { %v1598_v50 = vpop.permute.xlu1 %1597  ;;  %v753_v60 = vsel %vm750_vm6, %v743_v33, %v745_v47 }
 0x1b7   : > { %v1600_v51 = vunpack.i.h.bf16 %v1598_v50  ;;  %v1599_v52 = vunpack.i.l.bf16 %v1598_v50  ;;  %v2120_v7 = vsel %vm2070_vm8, %v2011_v21, %v753_v60 }
 0x1b8   : > { %v1510_v44 = vpack.c.bf16 %v2120_v7, %v2011_v21 }
 0x1b9   : > { %v737_v57 = vsel %vm733_vm2, %v1600_v51, %v1594_v38  ;;  %v734_v58 = vsel %vm733_vm2, %v1599_v52, %v1600_v51  ;;  %v735_v59 = vsel %vm733_vm2, %v1595_v37, %v1599_v52  ;;  %v749_v25 = vpop.permute.xlu0 %748  ;;  %v2159_v38 = vld [vmem:[#allocation4 + $0x3] ss:$4 sm:$0xf] }
 0x1ba   : > { %v2096_v26 = vsel %vm2061_vm4, %v2011_v21, %v737_v57  ;;  %v2101_v61 = vsel %vm2065_vm5, %v2022_v24, %v735_v59  ;;  %v2104_v62 = vsel %vm355_vm7, %v2026_v17, %v734_v58  ;;  %v747_v27 = vpop.permute.xlu1 %746  ;;  %v754_v63 = vsel %vm750_vm6, %v749_v25, %v743_v33 }
 0x1bb   : > { %v752_v1 = vsel %vm750_vm6, %v745_v47, %v747_v27  ;;  %v751_v2 = vsel %vm750_vm6, %v747_v27, %v749_v25  ;;  %v2113_v3 = vsel %vm382_vm11, %v2026_v17, %v754_v63  ;;  %v1611_v6 = vpack.i.bf16 %v2075_v54, %v2096_v26 }
 0x1bc   : > { %v2125_v22 = vsel %vm2077_vm9, %v2014_v10, %v752_v1  ;;  %v2130_v8 = vsel %vm2081_vm10, %v2022_v24, %v751_v2  ;;  %v1616_v23 = vpack.i.bf16 %v2104_v62, %v2101_v61  ;;  %v397_v33 = vrot.slane %v384_v14, %v2046_v30 }
 0x1bd   : > { %1612 = vrot.lane.b32.xlu1 %v1611_v6, %s1773_s13  ;;  %v1631_v9 = vpack.i.bf16 %v2113_v3, %v2130_v8  ;;  %v1621_v31 = vpack.i.bf16 %v2125_v22, %v2120_v7  ;;  %v1508_v43 = vpack.c.bf16 %v2125_v22, %v2014_v10  ;;  %v420_v49 = vrot.slane %v2159_v38, %v2040_v19 }
 0x1be   : > { %1617 = vrot.lane.b32.xlu0 %v1616_v23, %s1773_s13  ;;  %v1603_v15 = vpop.permute.xlu1 %1602  ;;  %vm2173_vm0 = vcmp.gt.f32.partialorder %v397_v33, 0.5  ;;  %v428_v53 = vrot.slane %v2159_v38, %v2048_v32  ;;  %v416_v55 = vrot.slane %v2159_v38, %v2044_v29  ;;  %v424_v59 = vrot.slane %v2159_v38, %v2046_v30 }
 0x1bf   : > { %v1605_v34 = vunpack.i.h.bf16 %v1603_v15  ;;  %v1604_v35 = vunpack.i.l.bf16 %v1603_v15  ;;  %v1526_v41 = vpack.c.bf16 %v2130_v8, %v2022_v24  ;;  %vm2259_vm2 = vcmp.gt.f32.partialorder %v420_v49, 0.5 }
 0x1c0   : > { %vm2263_vm3 = vcmp.gt.f32.partialorder %v428_v53, 0.5  ;;  %vm2268_vm4 = vcmp.gt.f32.partialorder %v416_v55, 0.5  ;;  %vm2277_vm5 = vcmp.gt.f32.partialorder %v424_v59, 0.5  ;;  %vm936_vm6 = vcmask 588800  }
 0x1c1   : > { %1622 = vrot.lane.b32.xlu1 %v1621_v31, %s1773_s13  ;;  %v790_v45 = vsel %vm767_vm12, %v1604_v35, %v1605_v34  ;;  %vm1209_vm7 = vcmask 64512  }
 0x1c2   : > { %1632 = vrot.lane.b32.xlu0 %v1631_v9, %s1773_s13  ;;  %v793_v60 = vsel %vm2161_vm13, %v2014_v10, %v790_v45  ;;  %s314_s13 = scalar_lea.vmem [#allocation7], %s1467_s12 }
 0x1c5   : > { %1627 = vrot.lane.b32.xlu1 %v2020_v11, %s1774_s18  ;;  %v930_v11 = vld [vmem:[%s2491_s5] sm:$0xff] }
 0x1c6   : > { %1637 = vrot.lane.b32.xlu0 %v2030_v18, %s1774_s18  ;;  %v1608_v18 = vpop.permute.xlu0 %1607 }
 0x1c7   : > { %v1610_v36 = vunpack.i.h.bf16 %v1608_v18  ;;  %v1609_v37 = vunpack.i.l.bf16 %v1608_v18 }
 0x1c9   : > { %1642 = vrot.lane.b32.xlu1 %v1611_v6, %s1774_s18  ;;  %v788_v46 = vsel %vm767_vm12, %v1609_v37, %v1610_v36  ;;  %v791_v47 = vsel %vm767_vm12, %v1610_v36, %v1604_v35  ;;  %v789_v56 = vsel %vm767_vm12, %v1605_v34, %v1609_v37 }
 0x1ca   : > { %1647 = vrot.lane.b32.xlu0 %v1616_v23, %s1774_s18  ;;  %v795_v32 = vsel %vm2165_vm14, %v2026_v17, %v788_v46  ;;  %v792_v29 = vsel %vm2169_vm15, %v2011_v21, %v791_v47  ;;  %v794_v28 = vsel %vm2173_vm0, %v2022_v24, %v789_v56 }
 0x1cd   : > { %873 = vrot.lane.b32.xlu1 %v2120_v7, %s1774_s18 }
 0x1ce   : > { %875 = vrot.lane.b32.xlu0 %v2125_v22, %s1774_s18 }
 0x1d1   : > { %877 = vrot.lane.b32.xlu1 %v2130_v8, %s1774_s18 }
 0x1d2   : > { %879 = vrot.lane.b32.xlu0 %v2113_v3, %s1774_s18  ;;  %s1387_s18 = sshll.u32 %s314_s13, 4  ;;  %s2438_s18 = int_to_ptr.vmem [resolvable:$true] %s1387_s18 }
 0x1d3   : > { %s1700_s9 = scalar_lea.vmem %s2438_s18, 256 }
 0x1d4   : > { %p1701_p5 = scmp.ne.s32.totalorder %s2438_s18, %s1700_s9 }
 0x1d5   : > { %933 = vperm.xlu1 %1651, %v930_v11  }
 0x1d6   : > { %1206 = vperm.xlu0 %1590, %v1203_v13   ;;  %p1702_p10 = pnand %p1701_p5, %p2531_p9 }
 0x1d8   : > { %p1703_p12 = pneg %p1702_p10 }
 0x22f   : > { %v1613_v48 = vpop.permute.xlu1 %1612 }
 0x230   : > { %v1615_v50 = vunpack.i.h.bf16 %v1613_v48  ;;  %v1614_v51 = vunpack.i.l.bf16 %v1613_v48  ;;  %v1618_v52 = vpop.permute.xlu0 %1617 }
 0x231   : > { %v1620_v57 = vunpack.i.h.bf16 %v1618_v52  ;;  %v1619_v58 = vunpack.i.l.bf16 %v1618_v52 }
 0x232   : > { %v770_v19 = vsel %vm767_vm12, %v1614_v51, %v1615_v50 }
 0x233   : > { %v771_v25 = vsel %vm767_vm12, %v1620_v57, %v1614_v51  ;;  %v768_v30 = vsel %vm767_vm12, %v1619_v58, %v1620_v57  ;;  %v769_v27 = vsel %vm767_vm12, %v1615_v50, %v1619_v58  ;;  %v1623_v63 = vpop.permute.xlu1 %1622  ;;  %v773_v1 = vsel %vm2161_vm13, %v2075_v54, %v770_v19 }
 0x234   : > { %v1625_v2 = vunpack.i.h.bf16 %v1623_v63  ;;  %v1624_v6 = vunpack.i.l.bf16 %v1623_v63  ;;  %v1633_v23 = vpop.permute.xlu0 %1632  ;;  %v1500_v9 = vpack.c.bf16 %v793_v60, %v773_v1  ;;  %v775_v31 = vsel %vm2165_vm14, %v2104_v62, %v768_v30 }
 0x235   : > { %v1635_v13 = vunpack.i.h.bf16 %v1633_v23  ;;  %v1634_v11 = vunpack.i.l.bf16 %v1633_v23  ;;  %v1516_v14 = vpack.c.bf16 %v795_v32, %v775_v31  ;;  %v772_v15 = vsel %vm2169_vm15, %v2096_v26, %v771_v25 }
 0x236   : > { %v810_v18 = vsel %vm767_vm12, %v1624_v6, %v1625_v2  ;;  %1501 = vmatprep.subr.bf16.mxu0 %v1500_v9  ;;  %v1502_v12 = vpack.c.bf16 %v792_v29, %v772_v15  ;;  %v774_v16 = vsel %vm2173_vm0, %v2101_v61, %v769_v27  ;;  %v1524_v58 = vpack.c.bf16 %v2113_v3, %v2026_v17 }
 0x237   : > { %v811_v33 = vsel %vm767_vm12, %v1635_v13, %v1624_v6  ;;  %v808_v34 = vsel %vm767_vm12, %v1634_v11, %v1635_v13  ;;  %v809_v35 = vsel %vm767_vm12, %v1625_v2, %v1634_v11  ;;  %1517 = vmatprep.subr.bf16.mxu1 %v1516_v14  ;;  %v1628_v36 = vpop.permute.xlu1 %1627  ;;  %v1518_v37 = vpack.c.bf16 %v794_v28, %v774_v16 }
 0x238   : > { %v1630_v38 = vunpack.i.h.bf16 %v1628_v36  ;;  %v1629_v45 = vunpack.i.l.bf16 %v1628_v36  ;;  %1503 = vmatpush1.bf16.msra.mxu0 %v1502_v12  ;;  %v1638_v46 = vpop.permute.xlu0 %1637  ;;  %v813_v47 = vsel %vm2161_vm13, %v2125_v22, %v810_v18  ;;  %v812_v48 = vsel %vm2169_vm15, %v2120_v7, %v811_v33 }
 0x239   : > { %1519 = vmatpush1.bf16.msra.mxu1 %v1518_v37  ;;  %v1640_v50 = vunpack.i.h.bf16 %v1638_v46  ;;  %v1639_v51 = vunpack.i.l.bf16 %v1638_v46  ;;  %v1504_v52 = vpack.c.bf16 %v2075_v54, %v813_v47  ;;  %v1506_v56 = vpack.c.bf16 %v2096_v26, %v812_v48  ;;  %v893_v37 = vld [vmem:[%s2490_s4] sm:$0xff] }
 0x23a   : > { %v815_v57 = vsel %vm2165_vm14, %v2113_v3, %v808_v34  ;;  %v814_v39 = vsel %vm2173_vm0, %v2130_v8, %v809_v35  ;;  %v863_v55 = vsel %vm840_vm1, %v1629_v45, %v1630_v38 }
 0x23b   : > { %v862_v19 = vsel %vm840_vm1, %v1630_v38, %v1639_v51  ;;  %1505 = vmatprep.subr.bf16.mxu0 %v1504_v52  ;;  %v1643_v60 = vpop.permute.xlu1 %1642  ;;  %v1520_v32 = vpack.c.bf16 %v2104_v62, %v815_v57  ;;  %v1522_v27 = vpack.c.bf16 %v2101_v61, %v814_v39  ;;  %v864_v49 = vsel %vm840_vm1, %v1640_v50, %v1629_v45 }
 0x23c   : > { %v1645_v29 = vunpack.i.h.bf16 %v1643_v60  ;;  %v1644_v25 = vunpack.i.l.bf16 %v1643_v60  ;;  %1507 = vmatpush1.bf16.msra.mxu0 %v1506_v56  ;;  %v1648_v30 = vpop.permute.xlu0 %1647  ;;  %v861_v6 = vsel %vm840_vm1, %v1639_v51, %v1640_v50  ;;  %v866_v9 = vsel %vm2259_vm2, %v2014_v10, %v862_v19 }
 0x23d   : > { %1521 = vmatprep.subr.bf16.mxu1 %v1520_v32  ;;  %v1650_v1 = vunpack.i.h.bf16 %v1648_v30  ;;  %v1649_v2 = vunpack.i.l.bf16 %v1648_v30  ;;  %1509 = vmatprep.subr.bf16.mxu0 %v1508_v43  ;;  %v868_v18 = vsel %vm2263_vm3, %v2026_v17, %v864_v49 }
 0x23e   : > { %v843_v23 = vsel %vm840_vm1, %v1644_v25, %v1645_v29  ;;  %1523 = vmatpush1.bf16.msra.mxu1 %v1522_v27 }
 0x23f   : > { %v844_v43 = vsel %vm840_vm1, %v1650_v1, %v1644_v25  ;;  %v841_v59 = vsel %vm840_vm1, %v1649_v2, %v1650_v1  ;;  %v842_v31 = vsel %vm840_vm1, %v1645_v29, %v1649_v2  ;;  %1525 = vmatprep.subr.bf16.mxu1 %v1524_v58  ;;  %v874_v13 = vpop.permute.xlu1 %873  ;;  %v845_v11 = vsel %vm2268_vm4, %v2096_v26, %v843_v23 }
 0x240   : > { %1511 = vmatpush1.bf16.msra.mxu0 %v1510_v44  ;;  %v876_v10 = vpop.permute.xlu0 %875  ;;  %v846_v14 = vsel %vm2259_vm2, %v2075_v54, %v842_v31  ;;  %v848_v15 = vsel %vm2263_vm3, %v2104_v62, %v844_v43  ;;  %v847_v26 = vsel %vm2277_vm5, %v2101_v61, %v841_v59  ;;  %v865_v44 = vsel %vm2268_vm4, %v2011_v21, %v863_v55 }
 0x241   : > { %v1512_v12 = vpack.c.bf16 %v866_v9, %v846_v14  ;;  %v1528_v16 = vpack.c.bf16 %v868_v18, %v848_v15  ;;  %v867_v54 = vsel %vm2277_vm5, %v2022_v24, %v861_v6  ;;  %v1514_v62 = vpack.c.bf16 %v865_v44, %v845_v11 }
 0x242   : > { %1527 = vmatpush1.bf16.msra.mxu1 %v1526_v41  ;;  %v1530_v28 = vpack.c.bf16 %v867_v54, %v847_v26  ;;  %v883_v17 = vsel %vm840_vm1, %v874_v13, %v876_v10 }
 0x243   : > { %v878_v33 = vpop.permute.xlu1 %877  ;;  %1513 = vmatprep.subr.bf16.mxu0 %v1512_v12  ;;  %1529 = vmatprep.subr.bf16.mxu1 %v1528_v16  ;;  %v885_v20 = vsel %vm2268_vm4, %v2120_v7, %v883_v17 }
 0x244   : > { %v882_v61 = vsel %vm840_vm1, %v876_v10, %v878_v33  ;;  %v880_v34 = vpop.permute.xlu0 %879  ;;  %1515 = vmatpush1.bf16.msra.mxu0 %v1514_v62 }
 0x245   : > { %v881_v21 = vsel %vm840_vm1, %v878_v33, %v880_v34  ;;  %v884_v24 = vsel %vm840_vm1, %v880_v34, %v874_v13  ;;  %v886_v35 = vsel %vm2259_vm2, %v2125_v22, %v882_v61 }
 0x246   : > { %1531 = vmatpush1.bf16.msra.mxu1 %v1530_v28  ;;  %956 = vmatprep.subr.mxu0 %v886_v35  ;;  %v888_v36 = vsel %vm2263_vm3, %v2113_v3, %v884_v24  ;;  %v887_v22 = vsel %vm2277_vm5, %v2130_v8, %v881_v21 }
 0x247   : > { %1027 = vmatprep.subr.mxu1 %v888_v36 }
 0x248   : > { %957 = vmatpush1.msra.mxu0 %v885_v20 }
 0x249   : > { %1482 = vmatmul.mubr.msk.f32.vlgmr.msra.gmra.mrb[2].mxu0 %vm936_vm6, %v893_v37 }
 0x24a   : > { %1028 = vmatpush1.msra.mxu1 %v887_v22  ;;  %1277 = vmatprep.mubr.f32.mxu0 %v1769_v0 }
 0x24b   : > { %1483 = vmatmul.mubr.msk.f32.vlgmr.msra.gmra.mrb[2].mxu1 %vm936_vm6, %v893_v37 }
 0x24c   : > { %1348 = vmatprep.mubr.f32.mxu1 %v1769_v0 }
 0x254   : > { %v934_v3 = vpop.permute.xlu1 %933 }
 0x31c   : > { %v1006_v38 = vpop.f32.mrb[2].mxu0 }
 0x31d   : > { %v2345_v45 = vadd.f32 %v1006_v38, %v934_v3  ;;  %v1008_v46 = vpop.f32.mrb[3].mxu0 }
 0x31e   : > { %v1077_v47 = vpop.f32.mrb[2].mxu1  ;;  %v2347_v48 = vadd.f32 %v1008_v46, %v934_v3 }
 0x31f   : > { %v1086_v7 = vmul.f32 0.70710677, %v2345_v45  ;;  %v2350_v50 = vadd.f32 %v1077_v47, %v934_v3  ;;  %v1079_v8 = vpop.f32.mrb[3].mxu1 }
 0x320   : > { %v1087_v51 = vmul.f32 0.70710677, %v2347_v48  ;;  %v2353_v52 = vadd.f32 %v1079_v8, %v934_v3 }
 0x321   : > { %v2355_v56 = vclamps-f32 %v1086_v7, 4.0  ;;  %v1088_v0 = vmul.f32 0.70710677, %v2350_v50 }
 0x322   : > { %v2358_v57 = vclamps-f32 %v1087_v51, 4.0  ;;  %v1089_v39 = vmul.f32 0.70710677, %v2353_v52 }
 0x323   : > { %v2363_v58 = vmul.f32 %v2355_v56, %v2355_v56  ;;  %v2365_v41 = vclamps-f32 %v1088_v0, 4.0 }
 0x324   : > { %v2369_v19 = vmul.f32 %v2358_v57, %v2358_v57  ;;  %v2371_v60 = vclamps-f32 %v1089_v39, 4.0 }
 0x325   : > { %v1102_v32 = vmul.f32 -2.7261424e-10, %v2363_v58  ;;  %v1150_v40 = vmul.f32 -1.45660715e-05, %v2363_v58  ;;  %v2377_v42 = vmul.f32 %v2365_v41, %v2365_v41 }
 0x326   : > { %v1103_v29 = vmul.f32 -2.7261424e-10, %v2369_v19  ;;  %v2382_v25 = vmul.f32 %v2371_v60, %v2371_v60  ;;  %v1151_v30 = vmul.f32 -1.45660715e-05, %v2369_v19 }
 0x327   : > { %v1106_v27 = vadd.f32 2.7706815e-08, %v1102_v32  ;;  %v1154_v63 = vadd.f32 -0.00021337405, %v1150_v40  ;;  %v1104_v49 = vmul.f32 -2.7261424e-10, %v2377_v42 }
 0x328   : > { %v1152_v1 = vmul.f32 -1.45660715e-05, %v2377_v42  ;;  %v1107_v2 = vadd.f32 2.7706815e-08, %v1103_v29  ;;  %v1105_v53 = vmul.f32 -2.7261424e-10, %v2382_v25 }
 0x329   : > { %v1110_v55 = vmul.f32 %v1106_v27, %v2363_v58  ;;  %v1158_v6 = vmul.f32 %v1154_v63, %v2363_v58  ;;  %v1108_v23 = vadd.f32 2.7706815e-08, %v1104_v49  ;;  %v1155_v9 = vadd.f32 -0.00021337405, %v1151_v30 }
 0x32a   : > { %v1156_v43 = vadd.f32 -0.00021337405, %v1152_v1  ;;  %v1111_v59 = vmul.f32 %v1107_v2, %v2369_v19  ;;  %v1109_v31 = vadd.f32 2.7706815e-08, %v1105_v53  ;;  %v1153_v13 = vmul.f32 -1.45660715e-05, %v2382_v25 }
 0x32b   : > { %v1114_v11 = vadd.f32 -2.101024e-06, %v1110_v55  ;;  %v1162_v10 = vadd.f32 -0.001682827, %v1158_v6  ;;  %v1112_v14 = vmul.f32 %v1108_v23, %v2377_v42  ;;  %v1159_v15 = vmul.f32 %v1155_v9, %v2369_v19 }
 0x32c   : > { %v1160_v18 = vmul.f32 %v1156_v43, %v2377_v42  ;;  %v1115_v26 = vadd.f32 -2.101024e-06, %v1111_v59  ;;  %v1113_v12 = vmul.f32 %v1109_v31, %v2382_v25  ;;  %v1157_v16 = vadd.f32 -0.00021337405, %v1153_v13 }
 0x32d   : > { %v1118_v44 = vmul.f32 %v1114_v11, %v2363_v58  ;;  %v1166_v54 = vmul.f32 %v1162_v10, %v2363_v58  ;;  %v1116_v62 = vadd.f32 -2.101024e-06, %v1112_v14  ;;  %v1163_v28 = vadd.f32 -0.001682827, %v1159_v15 }
 0x32e   : > { %v1164_v33 = vadd.f32 -0.001682827, %v1160_v18  ;;  %v1119_v17 = vmul.f32 %v1115_v26, %v2369_v19  ;;  %v1117_v61 = vadd.f32 -2.101024e-06, %v1113_v12  ;;  %v1161_v34 = vmul.f32 %v1157_v16, %v2382_v25 }
 0x32f   : > { %v1122_v21 = vadd.f32 -5.6925062e-05, %v1118_v44  ;;  %v1170_v24 = vadd.f32 -0.0073733293, %v1166_v54  ;;  %v1120_v35 = vmul.f32 %v1116_v62, %v2377_v42  ;;  %v1167_v36 = vmul.f32 %v1163_v28, %v2369_v19 }
 0x330   : > { %v1168_v37 = vmul.f32 %v1164_v33, %v2377_v42  ;;  %v1123_v20 = vadd.f32 -5.6925062e-05, %v1119_v17  ;;  %v1121_v22 = vmul.f32 %v1117_v61, %v2382_v25  ;;  %v1165_v3 = vadd.f32 -0.001682827, %v1161_v34 }
 0x331   : > { %v1126_v38 = vmul.f32 %v1122_v21, %v2363_v58  ;;  %v1174_v46 = vmul.f32 %v1170_v24, %v2363_v58  ;;  %v1124_v47 = vadd.f32 -5.6925062e-05, %v1120_v35  ;;  %v1171_v7 = vadd.f32 -0.0073733293, %v1167_v36 }
 0x332   : > { %v1172_v8 = vadd.f32 -0.0073733293, %v1168_v37  ;;  %v1127_v51 = vmul.f32 %v1123_v20, %v2369_v19  ;;  %v1125_v0 = vadd.f32 -5.6925062e-05, %v1121_v22  ;;  %v1169_v39 = vmul.f32 %v1165_v3, %v2382_v25 }
 0x333   : > { %v1130_v32 = vadd.f32 -0.00073499064, %v1126_v38  ;;  %v1178_v40 = vadd.f32 -0.014264739, %v1174_v46  ;;  %v1128_v29 = vmul.f32 %v1124_v47, %v2377_v42  ;;  %v1175_v30 = vmul.f32 %v1171_v7, %v2369_v19 }
 0x334   : > { %v1176_v27 = vmul.f32 %v1172_v8, %v2377_v42  ;;  %v1131_v63 = vadd.f32 -0.00073499064, %v1127_v51  ;;  %v1129_v49 = vmul.f32 %v1125_v0, %v2382_v25  ;;  %v1173_v1 = vadd.f32 -0.0073733293, %v1169_v39  ;;  %v1670_v39 = vld [vmem:[%s1912_s22] sm:$0xff] }
 0x335   : > { %v1134_v2 = vmul.f32 %v1130_v32, %v2363_v58  ;;  %1662 = vrcp.f32 %v1178_v40  ;;  %v1132_v53 = vadd.f32 -0.00073499064, %v1128_v29  ;;  %v1179_v55 = vadd.f32 -0.014264739, %v1175_v30 }
 0x336   : > { %v1180_v6 = vadd.f32 -0.014264739, %v1176_v27  ;;  %v1135_v23 = vmul.f32 %v1131_v63, %v2369_v19  ;;  %v1133_v9 = vadd.f32 -0.00073499064, %v1129_v49  ;;  %v1177_v43 = vmul.f32 %v1173_v1, %v2382_v25  ;;  %v1671_v63 = vld [vmem:[%s1912_s22 + $0x8] sm:$0xff]  ;;  %s1775_s22 = smov [#allocation7]  }
 0x337   : > { %v1138_v59 = vadd.f32 -0.0029546, %v1134_v2  ;;  %v1136_v31 = vmul.f32 %v1132_v53, %v2377_v42  ;;  %1664 = vrcp.f32 %v1179_v55  ;;  %v1084_v47 = vmul.f32 0.5, %v2350_v50  ;;  %s1704_s24 = sshll.u32 %s1775_s22, 4  ;;  %s1705_s24 = int_to_ptr.vmem [resolvable:$false] %s1704_s24 }
 0x338   : > { %1666 = vrcp.f32 %v1180_v6  ;;  %v1139_v13 = vadd.f32 -0.0029546, %v1135_v23  ;;  %v1137_v11 = vmul.f32 %v1133_v9, %v2382_v25  ;;  %v1181_v10 = vadd.f32 -0.014264739, %v1177_v43  ;;  %s1706_s25 = scalar_lea.vmem %s1705_s24, 512  ;;  %p1707_p2 = scmp.lt.s32.totalorder %s2438_s18, %s1705_s24 }
 0x339   : > { %v1142_v14 = vmul.f32 %v1138_v59, %v2363_v58  ;;  %v1140_v15 = vadd.f32 -0.0029546, %v1136_v31  ;;  %p1708_p3 = scmp.lt.s32.totalorder %s1706_s25, %s1700_s9 }
 0x33a   : > { %v1143_v18 = vmul.f32 %v1139_v13, %v2369_v19  ;;  %v1141_v26 = vadd.f32 -0.0029546, %v1137_v11  ;;  %1668 = vrcp.f32 %v1181_v10 }
 0x33b   : > { %v1146_v12 = vadd.f32 -0.016096033, %v1142_v14  ;;  %v1144_v16 = vmul.f32 %v1140_v15, %v2377_v42  ;;  %p1709_p4 = por %p1708_p3, %p1707_p2 }
 0x33c   : > { %v1147_v44 = vadd.f32 -0.016096033, %v1143_v18  ;;  %v1145_v54 = vmul.f32 %v1141_v26, %v2382_v25  ;;  %v1083_v25 = vmul.f32 0.5, %v2347_v48 }
 0x33d   : > { %v1182_v62 = vmul.f32 %v2355_v56, %v1146_v12  ;;  %v1148_v28 = vadd.f32 -0.016096033, %v1144_v16  ;;  %v1082_v56 = vmul.f32 0.5, %v2345_v45  ;;  %p1710_p7 = pnand %p1709_p4, %p1703_p12 }
 0x33e   : > { %v1183_v33 = vmul.f32 %v2358_v57, %v1147_v44  ;;  %v1149_v17 = vadd.f32 -0.016096033, %v1145_v54 }
 0x33f   : > { %v1663_v61 = vpop.eup %1662  ;;  %v1184_v58 = vmul.f32 %v2365_v41, %v1148_v28  ;;  %v1085_v41 = vmul.f32 0.5, %v2353_v52  ;;  %v1207_v52 = vpop.permute.xlu0 %1206 }
 0x340   : > { %v1190_v34 = vmul.f32 %v1663_v61, %v1182_v62  ;;  %v1185_v19 = vmul.f32 %v2371_v60, %v1149_v17  ;;  %v1202_v60 = vld [vmem:[%s2492_s6] sm:$0xf] }
 0x341   : > { %v1665_v21 = vpop.eup %1664 }
 0x342   : > { %v1667_v24 = vpop.eup %1666  ;;  %v1191_v35 = vmul.f32 %v1665_v21, %v1183_v33  ;;  %v1194_v36 = vadd.f32 1.0, %v1190_v34 }
 0x343   : > { %v1192_v42 = vmul.f32 %v1667_v24, %v1184_v58 }
 0x344   : > { %v1669_v37 = vpop.eup %1668  ;;  %v1195_v20 = vadd.f32 1.0, %v1191_v35  ;;  %v1198_v38 = vmul.f32 %v1194_v36, %v1082_v56 }
 0x345   : > { %v1193_v22 = vmul.f32 %v1669_v37, %v1185_v19  ;;  %v1196_v57 = vadd.f32 1.0, %v1192_v42 }
 0x346   : > { %v1199_v3 = vmul.f32 %v1195_v20, %v1083_v25 }
 0x347   : > { %v1197_v46 = vadd.f32 1.0, %v1193_v22  ;;  %v1200_v45 = vmul.f32 %v1196_v57, %v1084_v47 }
 0x348   : > { %1213 = vmatprep.subr.mxu0 %v1199_v3 }
 0x349   : > { %v1201_v48 = vmul.f32 %v1197_v46, %v1085_v41  ;;  %1214 = vmatpush1.msra.mxu0 %v1198_v38 }
 0x34a   : > { %1488 = vmatmul.mubr.msk.f32.vlgmr.msra.gmra.mrb[4].mxu0 %vm1209_vm7, %v1202_v60 }
 0x34b   : > { %1284 = vmatprep.subr.mxu1 %v1201_v48 }
 0x34c   : > { %1285 = vmatpush1.msra.mxu1 %v1200_v45 }
 0x34d   : > { %1489 = vmatmul.mubr.msk.f32.vlgmr.msra.gmra.mrb[4].mxu1 %vm1209_vm7, %v1202_v60 }
 0x41d   : > { %v1279_v7 = vpop.f32.mrb[4].mxu0 }
 0x41e   : > { %v1280_v8 = vadd.f32 %v1279_v7, %v1207_v52  ;;  %v1281_v51 = vpop.f32.mrb[5].mxu0 }
 0x41f   : > { %v1282_v0 = vadd.f32 %v1281_v51, %v1207_v52 }
 0x420   : > { %v1357_v50 = vadd.f32 %v1670_v39, %v1280_v8  ;;  %v1350_v32 = vpop.f32.mrb[4].mxu1 }
 0x421   : > { %v1351_v40 = vadd.f32 %v1350_v32, %v1207_v52  ;;  %v1358_v29 = vadd.f32 %v1282_v0, %v1916_v4  ;;  %v1352_v30 = vpop.f32.mrb[5].mxu1 }
 0x422   : > { %v1353_v27 = vadd.f32 %v1352_v30, %v1207_v52 }
 0x423   : > { %v1359_v49 = vadd.f32 %v1671_v63, %v1351_v40  ;;  %v1363_v1 = vcombine.low %v1357_v50, %v1358_v29 }
 0x424   : > { %v1360_v2 = vadd.f32 %v1353_v27, %v1918_v5 }
 0x425   : > { %1365 = vst [vmem:[%s314_s13] sm:$0xff] %v1363_v1 }
 0x426   : > { %v1368_v4 = vcombine.low %v1359_v49, %v1360_v2 }
 0x428   : > { %1490 = vst [vmem:[%s314_s13 + $0x8] sm:$0xff] %v1368_v4 }
 0x429   : > { %1713 = shalt.err (!%p1710_p7)
}
 0x42a   : > { %s1714_s26 = scalar_lea.hbm %s2443_s20, 256  ;;  %s1718_s13 = scalar_lea.hbm %s2494_s8, 512 }
 0x42b   : > { %p1715_p8 = scmp.ne.s32.totalorder %s2443_s20, %s1714_s26  ;;  %p1719_p1 = scmp.lt.u32.totalorder %s2443_s20, %s2494_s8 }
 0x42c   : > { %p1720_p0 = scmp.lt.u32.totalorder %s1718_s13, %s1714_s26  ;;  %p1722_p5 = scmp.lt.u32.totalorder %s1714_s26, %s2443_s20 }
 0x42d   : > { %p1716_p11 = pnand %p1715_p8, %p2531_p9 }
 0x42e   : > { %p1721_p6 = por %p1720_p0, %p1719_p1 }
 0x42f   : > { %p1717_p13 = pneg %p1716_p11 }
 0x430   : > { %p1723_p10 = por %p1722_p5, %p1721_p6 }
 0x432   : > { %p1724_p12 = pnand %p1723_p10, %p1717_p13 }
 0x434   : > { %1727 = shalt.err (!%p1724_p12)
}
 0x435   : > { %s1776_s19 = smov 128   ;;  %s1777_s9 = smov 8  }
 0x436   : > { %1536 = dma.vmem_to_hbm [thread:$0]  (%p2531_p9), %s2438_s18, 256, %s2443_s20, %s2445_s23, %s1776_s19, %s1776_s19, %s1777_s9  }
 0x437 PF: > { %p1548_p2 = scmp.ge.s32.totalorder %s1766_s30, 2  ;;  %s1402_s22 = sand.u32 1, %s1754_s27  }
 0x438   : > { %p2532_p3 = scmp.ne.s32.totalorder %s2499_s16, 0  ;;  %s1403_s24 = scalar_lea.sflag [#allocation6], %s1402_s22 }
 0x43a   : > { %p1543_p4 = pnand %p1548_p2, %p2532_p3 }
 0x43c   : > { %1749 = dma.done.wait (!%p1543_p4), %s1403_s24, 256  }
 0x43d   : > { %1751 = vsyncadd (!%p1543_p4), %s1403_s24, 4294967040  ;;  %p19_p7 = scmp.ge.s32.totalorder %s1848_s11, 4   ;;  %s2533_s27 = smov %s1758_s28 }
 0x43e   : > { %s2534_s28 = smov %s1762_s29  ;;  %s2535_s29 = smov %s1859_s14 }
 0x43f   : > { %s2536_s30 = smov %s1848_s11  ;;  %21 = sbr.rel (!%p19_p7) target bundleno = 4 (0x4), region = 97 }
 0x446   :  { %1408 = vsyncpa [#allocation5], 1 }
 0x447   :  { %1410 = vsyncpa [#allocation5 + $0x1], 1 }
 0x448   :  { %1411 = vsyncpa [#allocation6], 1 }
 0x449   :  { %1413 = vsyncpa [#allocation6 + $0x1], 1 }

</bundles_post_ra>
